<compile_context>
chip_gen: v7x
topology: tpu7x:2x2x1
jax: 0.10.0
libtpu: 0.0.40
codegen_flags: <defaults>
</compile_context>

<pallas_src>
import math

import jax
import jax.numpy as jnp
from jax.experimental import pallas as pl
from jax.experimental.pallas import tpu as pltpu

# ----------------------- tiny synthetic BERT config -----------------------
VOCAB = 50
TYPE_VOCAB = 2
MAX_POS = 16
HIDDEN = 32
N_HEADS = 4
HEAD_DIM = HIDDEN // N_HEADS
INTERMEDIATE = 4 * HIDDEN
N_LAYERS = 2
LN_EPS = 1e-12          # BertLayerNorm eps

# Rows of the packed per-layer "misc" tensor (f32, width = INTERMEDIATE).
_R_BQ, _R_BK, _R_BV, _R_BO, _R_BI, _R_BO2 = 0, 1, 2, 3, 4, 5
_R_LN1G, _R_LN1B, _R_LN2G, _R_LN2B = 6, 7, 8, 9
_MISC_ROWS = 16         # padded to a sublane-friendly row count


# ------------------------------ in-kernel math ------------------------------
def _layernorm(x, gamma, beta):
    # LayerNorm over the hidden axis, biased variance, eps=1e-12 (BertLayerNorm).
    mu = jnp.mean(x, axis=-1, keepdims=True)
    c = x - mu
    var = jnp.mean(c * c, axis=-1, keepdims=True)
    return c * jax.lax.rsqrt(var + LN_EPS) * gamma + beta


def _gelu(x):
    # tanh-GELU (HF "gelu_new"); tanh runs on the EUP, relieving the VALU slot
    # on the widest (M x 4H) tensor of the layer.  Differs from exact erf-GELU
    # by <~1e-3 (review-approved trade-off).
    c = 0.7978845608028654  # sqrt(2/pi)
    return 0.5 * x * (1.0 + jnp.tanh(c * (x + 0.044715 * x * x * x)))


# --------------------------- fused encoder kernel ---------------------------
def _make_encoder_kernel(B, S):
    """One grid step == one full BERT encoder layer on the (B*S, H) state."""
    H, I, NH, HD = HIDDEN, INTERMEDIATE, N_HEADS, HEAD_DIM
    scale = 1.0 / math.sqrt(HD)

    def kernel(emb_ref, bias_ref, wqkv_ref, wo_ref, wi_ref, wo2_ref, misc_ref,
               o_ref):
        layer = pl.program_id(0)

        @pl.when(layer == 0)
        def _():
            # Embedding LayerNorm already applied in the wrapper; just seed the
            # resident carried state (dropout = identity in eval mode).
            o_ref[...] = emb_ref[...]

        h = o_ref[...]                          # carried hidden state (B*S, H) f32
        misc = misc_ref[0]                      # packed biases / LN params (16, I)
        h16 = h.astype(jnp.bfloat16)            # bf16 MXU operand, cast once

        # ------------------------- self-attention -------------------------
        def proj(i):
            # rows 0/1/2 of `misc` are the q/k/v biases, matching wqkv order.
            return (jnp.dot(h16, wqkv_ref[0, i], preferred_element_type=jnp.float32)
                    + misc[i:i + 1, :H])

        q = proj(_R_BQ) * scale                 # fold 1/sqrt(d_head) into Q (f32)
        k = proj(_R_BK)
        v = proj(_R_BV)

        def to_heads(x):
            # (B*S, H) f32 -> (B*N_HEADS, S, HEAD_DIM) bf16 via static
            # sublane/lane slices stacked on a new leading (batch) axis — no
            # transposes needed, and the batched einsums below contract over
            # exactly HEAD_DIM (no redundant MXU FLOPs).
            slabs = [x[b0 * S:(b0 + 1) * S, n * HD:(n + 1) * HD]
                     for b0 in range(B) for n in range(NH)]
            return jnp.stack(slabs).astype(jnp.bfloat16)

        qh, kh, vh = to_heads(q), to_heads(k), to_heads(v)

        # One batched QK^T over all (batch, head) pairs.
        s = jnp.einsum('bqd,bkd->bqk', qh, kh,
                       preferred_element_type=jnp.float32)      # (B*NH, S, S) f32
        s = s + bias_ref[...]                   # hoisted (1-mask)*-10000, (B*NH,1,S)
        s = s - jnp.max(s, axis=-1, keepdims=True)
        e = jnp.exp(s)
        p = e * pl.reciprocal(jnp.sum(e, axis=-1, keepdims=True), approx=True)

        # One batched P.V over all (batch, head) pairs.
        ctx = jnp.einsum('bqk,bkd->bqd', p.astype(jnp.bfloat16), vh,
                         preferred_element_type=jnp.float32)    # (B*NH, S, HD) f32

        # Attention output dense: Wo stored per head as (HD, H) slabs; summing
        # the per-head contributions equals the dense on the concatenated
        # context and avoids any lane-dim concatenation.
        rows = []
        for b0 in range(B):
            acc = None
            for n in range(NH):
                t = jnp.dot(ctx[b0 * NH + n].astype(jnp.bfloat16), wo_ref[0, n],
                            preferred_element_type=jnp.float32)
                acc = t if acc is None else acc + t
            rows.append(acc)
        attn = (jnp.concatenate(rows, axis=0) if B > 1 else rows[0])
        attn = attn + misc[_R_BO:_R_BO + 1, :H]

        # residual + LayerNorm (f32)
        h1 = _layernorm(attn + h,
                        misc[_R_LN1G:_R_LN1G + 1, :H],
                        misc[_R_LN1B:_R_LN1B + 1, :H])

        # --------------------------- feed-forward --------------------------
        inter = jnp.dot(h1.astype(jnp.bfloat16), wi_ref[0],
                        preferred_element_type=jnp.float32) + misc[_R_BI:_R_BI + 1, :]
        inter = _gelu(inter)
        out = jnp.dot(inter.astype(jnp.bfloat16), wo2_ref[0],
                      preferred_element_type=jnp.float32) + misc[_R_BO2:_R_BO2 + 1, :H]
        o_ref[...] = _layernorm(out + h1,
                                misc[_R_LN2G:_R_LN2G + 1, :H],
                                misc[_R_LN2B:_R_LN2B + 1, :H])

    return kernel


# ------------------------------- model glue --------------------------------
def bert_forward(params, input_ids, segs, mask):
    """Equivalent of `top_vec, _ = self.model(x, segs, attention_mask=mask)`
    in eval mode; returns top_vec (last hidden state), shape (B, S, HIDDEN)."""
    B, S = input_ids.shape
    M = B * S
    H, I = HIDDEN, INTERMEDIATE

    # TODO(synk): embedding lookups are gathers with no clean Pallas TPU
    # equivalent at this scale; they stay in XLA glue. Everything downstream
    # (all encoder layers) runs in ONE fused pallas_call.
    word = params["word_emb"][input_ids]                 # (B, S, H)
    pos = params["pos_emb"][jnp.arange(S)][None, :, :]   # (1, S, H)
    tok = params["type_emb"][segs]                       # (B, S, H)
    emb = (word + pos + tok).astype(jnp.float32)

    # Embedding LayerNorm in the wrapper (layer-invariant; keeps only one full
    # (M,H) block needed by the kernel besides the carried state).
    mu = jnp.mean(emb, axis=-1, keepdims=True)
    var = jnp.mean((emb - mu) ** 2, axis=-1, keepdims=True)
    emb = (emb - mu) * jax.lax.rsqrt(var + LN_EPS) * params["emb_ln_g"] + params["emb_ln_b"]
    emb = emb.reshape(M, H)

    # HF extended attention mask, hoisted out of the kernel and replicated per
    # head so it broadcasts directly against the (B*NH, S, S) scores.
    neg_bias = (1.0 - mask.astype(jnp.float32)) * -10000.0          # (B, S)
    neg_bias = jnp.repeat(neg_bias[:, None, None, :], N_HEADS, axis=1)
    neg_bias = neg_bias.reshape(B * N_HEADS, 1, S)

    def const_spec(shape):
        return pl.BlockSpec(shape, lambda l, _s=shape: tuple(0 for _ in _s))

    def layer_spec(shape):
        return pl.BlockSpec((1,) + shape,
                            lambda l, _s=shape: (l,) + tuple(0 for _ in _s))

    grid_spec = pltpu.PrefetchScalarGridSpec(
        num_scalar_prefetch=0,
        grid=(N_LAYERS,),
        in_specs=[
            const_spec((M, H)),                    # LN'd embeddings (layer 0 only)
            const_spec((B * N_HEADS, 1, S)),       # attention bias (per head)
            layer_spec((3, H, H)),                 # stacked Wq/Wk/Wv   (bf16)
            layer_spec((N_HEADS, HEAD_DIM, H)),    # per-head Wo slabs  (bf16)
            layer_spec((H, I)),                    # intermediate dense (bf16)
            layer_spec((I, H)),                    # output dense       (bf16)
            layer_spec((_MISC_ROWS, I)),           # packed biases + LN params (f32)
        ],
        out_specs=pl.BlockSpec((M, H), lambda l: (0, 0)),
    )

    top_flat = pl.pallas_call(
        _make_encoder_kernel(B, S),
        out_shape=jax.ShapeDtypeStruct((M, H), jnp.float32),
        grid_spec=grid_spec,
        compiler_params=pltpu.CompilerParams(
            dimension_semantics=("arbitrary",),   # layers are sequential
            vmem_limit_bytes=32 * 1024 * 1024,    # explicit VMEM budget; raise at
                                                  # BERT-base scale (bf16 weights keep
                                                  # the double-buffered layer small)
        ),
    )(
        emb, neg_bias,
        params["wqkv"], params["wo"], params["wi"], params["wo2"], params["misc"],
    )
    return top_flat.reshape(B, S, HIDDEN)


def init_params(key):
    def nrm(k, shape, dtype=jnp.float32):
        return (0.02 * jax.random.normal(k, shape)).astype(dtype)

    ks = jax.random.split(key, 9)
    L, H, I, NH, HD = N_LAYERS, HIDDEN, INTERMEDIATE, N_HEADS, HEAD_DIM

    # Packed small per-layer tensors (one DMA per layer): q/k/v/out/FFN biases
    # and LayerNorm gammas/betas, all f32, width = INTERMEDIATE (H slots used
    # for the H-wide rows).
    misc = jnp.zeros((L, _MISC_ROWS, I), jnp.float32)
    misc = misc.at[:, _R_BI, :].set(nrm(ks[6], (L, I)))     # intermediate bias
    misc = misc.at[:, _R_LN1G, :H].set(1.0)                 # LN1 gamma
    misc = misc.at[:, _R_LN2G, :H].set(1.0)                 # LN2 gamma
    # (q/k/v/out/FFN-out biases and LN betas stay zero, like the reference init)

    return {
        "word_emb": nrm(ks[0], (VOCAB, H)),
        "pos_emb": nrm(ks[1], (MAX_POS, H)),
        "type_emb": nrm(ks[2], (TYPE_VOCAB, H)),
        "emb_ln_g": jnp.ones((H,), jnp.float32),
        "emb_ln_b": jnp.zeros((H,), jnp.float32),
        # Matmul weights stored in bf16 (MXU-native; halves the per-layer DMA
        # bytes and the double-buffered VMEM footprint), stacked on a leading
        # layer axis and streamed by the fused kernel's BlockSpec index_maps.
        "wqkv": nrm(ks[3], (L, 3, H, H), jnp.bfloat16),
        "wo": nrm(ks[4], (L, NH, HD, H), jnp.bfloat16),     # per-head output slabs
        "wi": nrm(ks[5], (L, H, I), jnp.bfloat16),
        "wo2": nrm(ks[7], (L, I, H), jnp.bfloat16),
        "misc": misc,
    }


if __name__ == "__main__":
    B, S = 2, 8
    root = jax.random.PRNGKey(0)
    k_params, k_ids = jax.random.split(root, 2)

    params = init_params(k_params)

    input_ids = jax.random.randint(k_ids, (B, S), 1, VOCAB, dtype=jnp.int32)
    segs = jnp.concatenate(
        [jnp.zeros((B, S // 2), jnp.int32), jnp.ones((B, S // 2), jnp.int32)], axis=1
    )
    # attention mask: 1 = real token, 0 = padding (pad out the last 2 positions)
    mask = jnp.ones((B, S), jnp.float32).at[:, -2:].set(0.0)

    top_vec = jax.jit(bert_forward)(params, input_ids, segs, mask)
    jax.block_until_ready(top_vec)
    assert top_vec.shape == (B, S, HIDDEN) and top_vec.dtype == jnp.float32
    assert bool(jnp.all(jnp.isfinite(top_vec)))
    print("KERNEL_OK")
</pallas_src>

<mosaic_0001>
module attributes {stable_mosaic.version = 11 : i64} {
  func.func @kernel(%arg0: i32, %arg1: memref<16x32xf32, #tpu.memory_space<vmem>>, %arg2: memref<8x1x8xf32, #tpu.memory_space<vmem>>, %arg3: memref<1x3x32x32xbf16, #tpu.memory_space<vmem>>, %arg4: memref<1x4x8x32xbf16, #tpu.memory_space<vmem>>, %arg5: memref<1x32x128xbf16, #tpu.memory_space<vmem>>, %arg6: memref<1x128x32xbf16, #tpu.memory_space<vmem>>, %arg7: memref<1x16x128xf32, #tpu.memory_space<vmem>>, %arg8: memref<16x32xf32, #tpu.memory_space<vmem>>) attributes {dimension_semantics = [#tpu.dimension_semantics<arbitrary>], iteration_bounds = array<i64: 2>, scalar_prefetch = 0 : i64, scratch_operands = 0 : i64, tpu.core_type = #tpu.core_type<tc>, window_params = [{pipeline_mode = #tpu.pipeline_mode<synchronous>, transform_indices = @transform_0, window_bounds = array<i64: 16, 32>}, {pipeline_mode = #tpu.pipeline_mode<synchronous>, transform_indices = @transform_1, window_bounds = array<i64: 8, 1, 8>}, {transform_indices = @transform_2, window_bounds = array<i64: 1, 3, 32, 32>}, {transform_indices = @transform_3, window_bounds = array<i64: 1, 4, 8, 32>}, {transform_indices = @transform_4, window_bounds = array<i64: 1, 32, 128>}, {transform_indices = @transform_5, window_bounds = array<i64: 1, 128, 32>}, {transform_indices = @transform_6, window_bounds = array<i64: 1, 16, 128>}, {pipeline_mode = #tpu.pipeline_mode<synchronous>, transform_indices = @transform_7, window_bounds = array<i64: 16, 32>}]} {
    %c0_i32 = arith.constant 0 : i32
    %0 = arith.cmpi eq, %arg0, %c0_i32 : i32
    %1 = arith.extui %0 : i1 to i32
    %c0_i32_0 = arith.constant 0 : i32
    %2 = arith.cmpi ne, %1, %c0_i32_0 : i32
    scf.if %2 {
      %c0_88 = arith.constant 0 : index
      %c0_89 = arith.constant 0 : index
      %229 = vector.load %arg1[%c0_88, %c0_89] : memref<16x32xf32, #tpu.memory_space<vmem>>, vector<16x32xf32>
      %c0_90 = arith.constant 0 : index
      %c0_91 = arith.constant 0 : index
      %230 = vector.load %arg8[%c0_90, %c0_91] : memref<16x32xf32, #tpu.memory_space<vmem>>, vector<16x32xf32>
      tpu.vector_store %arg8[%c0_90, %c0_91], %229 {strides = array<i32>} : memref<16x32xf32, #tpu.memory_space<vmem>>, vector<16x32xf32>,
    } else {
    }
    %c0 = arith.constant 0 : index
    %c0_1 = arith.constant 0 : index
    %3 = vector.load %arg8[%c0, %c0_1] : memref<16x32xf32, #tpu.memory_space<vmem>>, vector<16x32xf32>
    %c0_2 = arith.constant 0 : index
    %c0_3 = arith.constant 0 : index
    %c0_4 = arith.constant 0 : index
    %4 = vector.load %arg7[%c0_2, %c0_3, %c0_4] : memref<1x16x128xf32, #tpu.memory_space<vmem>>, vector<1x16x128xf32>
    %5 = vector.shape_cast %4 : vector<1x16x128xf32> to vector<16x128xf32>
    %6 = arith.truncf %3 : vector<16x32xf32> to vector<16x32xbf16>
    %c0_5 = arith.constant 0 : index
    %c0_6 = arith.constant 0 : index
    %c0_7 = arith.constant 0 : index
    %c0_8 = arith.constant 0 : index
    %7 = vector.load %arg3[%c0_5, %c0_6, %c0_7, %c0_8] : memref<1x3x32x32xbf16, #tpu.memory_space<vmem>>, vector<1x1x32x32xbf16>
    %8 = vector.shape_cast %7 : vector<1x1x32x32xbf16> to vector<32x32xbf16>
    %cst = arith.constant dense<0.000000e+00> : vector<16x32xf32>
    %9 = tpu.matmul %6, %8, %cst {dimension_numbers = #tpu.dot_dimension_numbers<[1], [0], [0], [1], [0, 0, 1, 1], [], []>} : vector<16x32xbf16>, vector<32x32xbf16>, vector<16x32xf32> -> vector<16x32xf32>
    %10 = vector.extract_strided_slice %5 {offsets = [0, 0], sizes = [1, 32], strides = [1, 1]} : vector<16x128xf32> to vector<1x32xf32>
    %11 = vector.broadcast %10 : vector<1x32xf32> to vector<16x32xf32>
    %12 = arith.addf %9, %11 : vector<16x32xf32>
    %cst_9 = arith.constant 0.353553385 : f32
    %13 = vector.broadcast %cst_9 : f32 to vector<16x32xf32>
    %14 = arith.mulf %12, %13 : vector<16x32xf32>
    %c0_10 = arith.constant 0 : index
    %c1 = arith.constant 1 : index
    %c0_11 = arith.constant 0 : index
    %c0_12 = arith.constant 0 : index
    %15 = vector.load %arg3[%c0_10, %c1, %c0_11, %c0_12] : memref<1x3x32x32xbf16, #tpu.memory_space<vmem>>, vector<1x1x32x32xbf16>
    %16 = vector.shape_cast %15 : vector<1x1x32x32xbf16> to vector<32x32xbf16>
    %cst_13 = arith.constant dense<0.000000e+00> : vector<16x32xf32>
    %17 = tpu.matmul %6, %16, %cst_13 {dimension_numbers = #tpu.dot_dimension_numbers<[1], [0], [0], [1], [0, 0, 1, 1], [], []>} : vector<16x32xbf16>, vector<32x32xbf16>, vector<16x32xf32> -> vector<16x32xf32>
    %18 = vector.extract_strided_slice %5 {offsets = [1, 0], sizes = [1, 32], strides = [1, 1]} : vector<16x128xf32> to vector<1x32xf32>
    %19 = vector.broadcast %18 : vector<1x32xf32> to vector<16x32xf32>
    %20 = arith.addf %17, %19 : vector<16x32xf32>
    %c0_14 = arith.constant 0 : index
    %c2 = arith.constant 2 : index
    %c0_15 = arith.constant 0 : index
    %c0_16 = arith.constant 0 : index
    %21 = vector.load %arg3[%c0_14, %c2, %c0_15, %c0_16] : memref<1x3x32x32xbf16, #tpu.memory_space<vmem>>, vector<1x1x32x32xbf16>
    %22 = vector.shape_cast %21 : vector<1x1x32x32xbf16> to vector<32x32xbf16>
    %cst_17 = arith.constant dense<0.000000e+00> : vector<16x32xf32>
    %23 = tpu.matmul %6, %22, %cst_17 {dimension_numbers = #tpu.dot_dimension_numbers<[1], [0], [0], [1], [0, 0, 1, 1], [], []>} : vector<16x32xbf16>, vector<32x32xbf16>, vector<16x32xf32> -> vector<16x32xf32>
    %24 = vector.extract_strided_slice %5 {offsets = [2, 0], sizes = [1, 32], strides = [1, 1]} : vector<16x128xf32> to vector<1x32xf32>
    %25 = vector.broadcast %24 : vector<1x32xf32> to vector<16x32xf32>
    %26 = arith.addf %23, %25 : vector<16x32xf32>
    %27 = vector.extract_strided_slice %14 {offsets = [0, 0], sizes = [8, 8], strides = [1, 1]} : vector<16x32xf32> to vector<8x8xf32>
    %28 = vector.extract_strided_slice %14 {offsets = [0, 8], sizes = [8, 8], strides = [1, 1]} : vector<16x32xf32> to vector<8x8xf32>
    %29 = vector.extract_strided_slice %14 {offsets = [0, 16], sizes = [8, 8], strides = [1, 1]} : vector<16x32xf32> to vector<8x8xf32>
    %30 = vector.extract_strided_slice %14 {offsets = [0, 24], sizes = [8, 8], strides = [1, 1]} : vector<16x32xf32> to vector<8x8xf32>
    %31 = vector.extract_strided_slice %14 {offsets = [8, 0], sizes = [8, 8], strides = [1, 1]} : vector<16x32xf32> to vector<8x8xf32>
    %32 = vector.extract_strided_slice %14 {offsets = [8, 8], sizes = [8, 8], strides = [1, 1]} : vector<16x32xf32> to vector<8x8xf32>
    %33 = vector.extract_strided_slice %14 {offsets = [8, 16], sizes = [8, 8], strides = [1, 1]} : vector<16x32xf32> to vector<8x8xf32>
    %34 = vector.extract_strided_slice %14 {offsets = [8, 24], sizes = [8, 8], strides = [1, 1]} : vector<16x32xf32> to vector<8x8xf32>
    %35 = vector.shape_cast %27 : vector<8x8xf32> to vector<1x8x8xf32>
    %36 = vector.shape_cast %28 : vector<8x8xf32> to vector<1x8x8xf32>
    %37 = vector.shape_cast %29 : vector<8x8xf32> to vector<1x8x8xf32>
    %38 = vector.shape_cast %30 : vector<8x8xf32> to vector<1x8x8xf32>
    %39 = vector.shape_cast %31 : vector<8x8xf32> to vector<1x8x8xf32>
    %40 = vector.shape_cast %32 : vector<8x8xf32> to vector<1x8x8xf32>
    %41 = vector.shape_cast %33 : vector<8x8xf32> to vector<1x8x8xf32>
    %42 = vector.shape_cast %34 : vector<8x8xf32> to vector<1x8x8xf32>
    %43 = tpu.concatenate %35, %36, %37, %38, %39, %40, %41, %42 in 0 : vector<1x8x8xf32>, vector<1x8x8xf32>, vector<1x8x8xf32>, vector<1x8x8xf32>, vector<1x8x8xf32>, vector<1x8x8xf32>, vector<1x8x8xf32>, vector<1x8x8xf32> -> vector<8x8x8xf32>
    %44 = arith.truncf %43 : vector<8x8x8xf32> to vector<8x8x8xbf16>
    %45 = vector.extract_strided_slice %20 {offsets = [0, 0], sizes = [8, 8], strides = [1, 1]} : vector<16x32xf32> to vector<8x8xf32>
    %46 = vector.extract_strided_slice %20 {offsets = [0, 8], sizes = [8, 8], strides = [1, 1]} : vector<16x32xf32> to vector<8x8xf32>
    %47 = vector.extract_strided_slice %20 {offsets = [0, 16], sizes = [8, 8], strides = [1, 1]} : vector<16x32xf32> to vector<8x8xf32>
    %48 = vector.extract_strided_slice %20 {offsets = [0, 24], sizes = [8, 8], strides = [1, 1]} : vector<16x32xf32> to vector<8x8xf32>
    %49 = vector.extract_strided_slice %20 {offsets = [8, 0], sizes = [8, 8], strides = [1, 1]} : vector<16x32xf32> to vector<8x8xf32>
    %50 = vector.extract_strided_slice %20 {offsets = [8, 8], sizes = [8, 8], strides = [1, 1]} : vector<16x32xf32> to vector<8x8xf32>
    %51 = vector.extract_strided_slice %20 {offsets = [8, 16], sizes = [8, 8], strides = [1, 1]} : vector<16x32xf32> to vector<8x8xf32>
    %52 = vector.extract_strided_slice %20 {offsets = [8, 24], sizes = [8, 8], strides = [1, 1]} : vector<16x32xf32> to vector<8x8xf32>
    %53 = vector.shape_cast %45 : vector<8x8xf32> to vector<1x8x8xf32>
    %54 = vector.shape_cast %46 : vector<8x8xf32> to vector<1x8x8xf32>
    %55 = vector.shape_cast %47 : vector<8x8xf32> to vector<1x8x8xf32>
    %56 = vector.shape_cast %48 : vector<8x8xf32> to vector<1x8x8xf32>
    %57 = vector.shape_cast %49 : vector<8x8xf32> to vector<1x8x8xf32>
    %58 = vector.shape_cast %50 : vector<8x8xf32> to vector<1x8x8xf32>
    %59 = vector.shape_cast %51 : vector<8x8xf32> to vector<1x8x8xf32>
    %60 = vector.shape_cast %52 : vector<8x8xf32> to vector<1x8x8xf32>
    %61 = tpu.concatenate %53, %54, %55, %56, %57, %58, %59, %60 in 0 : vector<1x8x8xf32>, vector<1x8x8xf32>, vector<1x8x8xf32>, vector<1x8x8xf32>, vector<1x8x8xf32>, vector<1x8x8xf32>, vector<1x8x8xf32>, vector<1x8x8xf32> -> vector<8x8x8xf32>
    %62 = arith.truncf %61 : vector<8x8x8xf32> to vector<8x8x8xbf16>
    %63 = vector.extract_strided_slice %26 {offsets = [0, 0], sizes = [8, 8], strides = [1, 1]} : vector<16x32xf32> to vector<8x8xf32>
    %64 = vector.extract_strided_slice %26 {offsets = [0, 8], sizes = [8, 8], strides = [1, 1]} : vector<16x32xf32> to vector<8x8xf32>
    %65 = vector.extract_strided_slice %26 {offsets = [0, 16], sizes = [8, 8], strides = [1, 1]} : vector<16x32xf32> to vector<8x8xf32>
    %66 = vector.extract_strided_slice %26 {offsets = [0, 24], sizes = [8, 8], strides = [1, 1]} : vector<16x32xf32> to vector<8x8xf32>
    %67 = vector.extract_strided_slice %26 {offsets = [8, 0], sizes = [8, 8], strides = [1, 1]} : vector<16x32xf32> to vector<8x8xf32>
    %68 = vector.extract_strided_slice %26 {offsets = [8, 8], sizes = [8, 8], strides = [1, 1]} : vector<16x32xf32> to vector<8x8xf32>
    %69 = vector.extract_strided_slice %26 {offsets = [8, 16], sizes = [8, 8], strides = [1, 1]} : vector<16x32xf32> to vector<8x8xf32>
    %70 = vector.extract_strided_slice %26 {offsets = [8, 24], sizes = [8, 8], strides = [1, 1]} : vector<16x32xf32> to vector<8x8xf32>
    %71 = vector.shape_cast %63 : vector<8x8xf32> to vector<1x8x8xf32>
    %72 = vector.shape_cast %64 : vector<8x8xf32> to vector<1x8x8xf32>
    %73 = vector.shape_cast %65 : vector<8x8xf32> to vector<1x8x8xf32>
    %74 = vector.shape_cast %66 : vector<8x8xf32> to vector<1x8x8xf32>
    %75 = vector.shape_cast %67 : vector<8x8xf32> to vector<1x8x8xf32>
    %76 = vector.shape_cast %68 : vector<8x8xf32> to vector<1x8x8xf32>
    %77 = vector.shape_cast %69 : vector<8x8xf32> to vector<1x8x8xf32>
    %78 = vector.shape_cast %70 : vector<8x8xf32> to vector<1x8x8xf32>
    %79 = tpu.concatenate %71, %72, %73, %74, %75, %76, %77, %78 in 0 : vector<1x8x8xf32>, vector<1x8x8xf32>, vector<1x8x8xf32>, vector<1x8x8xf32>, vector<1x8x8xf32>, vector<1x8x8xf32>, vector<1x8x8xf32>, vector<1x8x8xf32> -> vector<8x8x8xf32>
    %80 = arith.truncf %79 : vector<8x8x8xf32> to vector<8x8x8xbf16>
    "tpu.trace_start"() <{level = 10 : i32, message = "bqd,bkd->bqk"}> : () -> ()
    %cst_18 = arith.constant dense<0.000000e+00> : vector<8x8x8xf32>
    %81 = tpu.matmul %44, %62, %cst_18 {dimension_numbers = #tpu.dot_dimension_numbers<[2], [2], [1], [1], [0, 0, 0, 1, 1, 1], [0], [0]>} : vector<8x8x8xbf16>, vector<8x8x8xbf16>, vector<8x8x8xf32> -> vector<8x8x8xf32>
    "tpu.trace_stop"() : () -> ()
    %c0_19 = arith.constant 0 : index
    %c0_20 = arith.constant 0 : index
    %c0_21 = arith.constant 0 : index
    %82 = vector.load %arg2[%c0_19, %c0_20, %c0_21] : memref<8x1x8xf32, #tpu.memory_space<vmem>>, vector<8x1x8xf32>
    %83 = vector.broadcast %82 : vector<8x1x8xf32> to vector<8x8x8xf32>
    %84 = arith.addf %81, %83 : vector<8x8x8xf32>
    %cst_22 = arith.constant dense<0xFF800000> : vector<8x8xf32>
    %85 = vector.multi_reduction <maximumf>, %84, %cst_22 [2] : vector<8x8x8xf32> to vector<8x8xf32>
    %86 = vector.shape_cast %85 : vector<8x8xf32> to vector<8x8x1xf32>
    %87 = vector.broadcast %86 : vector<8x8x1xf32> to vector<8x8x8xf32>
    %88 = arith.subf %84, %87 : vector<8x8x8xf32>
    %89 = math.exp %88 : vector<8x8x8xf32>
    %cst_23 = arith.constant dense<0.000000e+00> : vector<8x8xf32>
    %90 = vector.multi_reduction <add>, %89, %cst_23 [2] : vector<8x8x8xf32> to vector<8x8xf32>
    %91 = vector.shape_cast %90 : vector<8x8xf32> to vector<8x8x1xf32>
    %92 = tpu.reciprocal %91 {approx = true} : vector<8x8x1xf32> -> vector<8x8x1xf32>
    %93 = vector.broadcast %92 : vector<8x8x1xf32> to vector<8x8x8xf32>
    %94 = arith.mulf %89, %93 : vector<8x8x8xf32>
    %95 = arith.truncf %94 : vector<8x8x8xf32> to vector<8x8x8xbf16>
    "tpu.trace_start"() <{level = 10 : i32, message = "bqk,bkd->bqd"}> : () -> ()
    %cst_24 = arith.constant dense<0.000000e+00> : vector<8x8x8xf32>
    %96 = tpu.matmul %95, %80, %cst_24 {dimension_numbers = #tpu.dot_dimension_numbers<[2], [1], [1], [2], [0, 0, 0, 1, 1, 2], [0], [0]>} : vector<8x8x8xbf16>, vector<8x8x8xbf16>, vector<8x8x8xf32> -> vector<8x8x8xf32>
    "tpu.trace_stop"() : () -> ()
    %97 = vector.extract_strided_slice %96 {offsets = [0, 0, 0], sizes = [1, 8, 8], strides = [1, 1, 1]} : vector<8x8x8xf32> to vector<1x8x8xf32>
    %98 = vector.shape_cast %97 : vector<1x8x8xf32> to vector<8x8xf32>
    %99 = arith.truncf %98 : vector<8x8xf32> to vector<8x8xbf16>
    %c0_25 = arith.constant 0 : index
    %c0_26 = arith.constant 0 : index
    %c0_27 = arith.constant 0 : index
    %c0_28 = arith.constant 0 : index
    %100 = vector.load %arg4[%c0_25, %c0_26, %c0_27, %c0_28] : memref<1x4x8x32xbf16, #tpu.memory_space<vmem>>, vector<1x1x8x32xbf16>
    %101 = vector.shape_cast %100 : vector<1x1x8x32xbf16> to vector<8x32xbf16>
    %cst_29 = arith.constant dense<0.000000e+00> : vector<8x32xf32>
    %102 = tpu.matmul %99, %101, %cst_29 {dimension_numbers = #tpu.dot_dimension_numbers<[1], [0], [0], [1], [0, 0, 1, 1], [], []>} : vector<8x8xbf16>, vector<8x32xbf16>, vector<8x32xf32> -> vector<8x32xf32>
    %103 = vector.extract_strided_slice %96 {offsets = [1, 0, 0], sizes = [1, 8, 8], strides = [1, 1, 1]} : vector<8x8x8xf32> to vector<1x8x8xf32>
    %104 = vector.shape_cast %103 : vector<1x8x8xf32> to vector<8x8xf32>
    %105 = arith.truncf %104 : vector<8x8xf32> to vector<8x8xbf16>
    %c0_30 = arith.constant 0 : index
    %c1_31 = arith.constant 1 : index
    %c0_32 = arith.constant 0 : index
    %c0_33 = arith.constant 0 : index
    %106 = vector.load %arg4[%c0_30, %c1_31, %c0_32, %c0_33] : memref<1x4x8x32xbf16, #tpu.memory_space<vmem>>, vector<1x1x8x32xbf16>
    %107 = vector.shape_cast %106 : vector<1x1x8x32xbf16> to vector<8x32xbf16>
    %cst_34 = arith.constant dense<0.000000e+00> : vector<8x32xf32>
    %108 = tpu.matmul %105, %107, %cst_34 {dimension_numbers = #tpu.dot_dimension_numbers<[1], [0], [0], [1], [0, 0, 1, 1], [], []>} : vector<8x8xbf16>, vector<8x32xbf16>, vector<8x32xf32> -> vector<8x32xf32>
    %109 = arith.addf %102, %108 : vector<8x32xf32>
    %110 = vector.extract_strided_slice %96 {offsets = [2, 0, 0], sizes = [1, 8, 8], strides = [1, 1, 1]} : vector<8x8x8xf32> to vector<1x8x8xf32>
    %111 = vector.shape_cast %110 : vector<1x8x8xf32> to vector<8x8xf32>
    %112 = arith.truncf %111 : vector<8x8xf32> to vector<8x8xbf16>
    %c0_35 = arith.constant 0 : index
    %c2_36 = arith.constant 2 : index
    %c0_37 = arith.constant 0 : index
    %c0_38 = arith.constant 0 : index
    %113 = vector.load %arg4[%c0_35, %c2_36, %c0_37, %c0_38] : memref<1x4x8x32xbf16, #tpu.memory_space<vmem>>, vector<1x1x8x32xbf16>
    %114 = vector.shape_cast %113 : vector<1x1x8x32xbf16> to vector<8x32xbf16>
    %cst_39 = arith.constant dense<0.000000e+00> : vector<8x32xf32>
    %115 = tpu.matmul %112, %114, %cst_39 {dimension_numbers = #tpu.dot_dimension_numbers<[1], [0], [0], [1], [0, 0, 1, 1], [], []>} : vector<8x8xbf16>, vector<8x32xbf16>, vector<8x32xf32> -> vector<8x32xf32>
    %116 = arith.addf %109, %115 : vector<8x32xf32>
    %117 = vector.extract_strided_slice %96 {offsets = [3, 0, 0], sizes = [1, 8, 8], strides = [1, 1, 1]} : vector<8x8x8xf32> to vector<1x8x8xf32>
    %118 = vector.shape_cast %117 : vector<1x8x8xf32> to vector<8x8xf32>
    %119 = arith.truncf %118 : vector<8x8xf32> to vector<8x8xbf16>
    %c0_40 = arith.constant 0 : index
    %c3 = arith.constant 3 : index
    %c0_41 = arith.constant 0 : index
    %c0_42 = arith.constant 0 : index
    %120 = vector.load %arg4[%c0_40, %c3, %c0_41, %c0_42] : memref<1x4x8x32xbf16, #tpu.memory_space<vmem>>, vector<1x1x8x32xbf16>
    %121 = vector.shape_cast %120 : vector<1x1x8x32xbf16> to vector<8x32xbf16>
    %cst_43 = arith.constant dense<0.000000e+00> : vector<8x32xf32>
    %122 = tpu.matmul %119, %121, %cst_43 {dimension_numbers = #tpu.dot_dimension_numbers<[1], [0], [0], [1], [0, 0, 1, 1], [], []>} : vector<8x8xbf16>, vector<8x32xbf16>, vector<8x32xf32> -> vector<8x32xf32>
    %123 = arith.addf %116, %122 : vector<8x32xf32>
    %124 = vector.extract_strided_slice %96 {offsets = [4, 0, 0], sizes = [1, 8, 8], strides = [1, 1, 1]} : vector<8x8x8xf32> to vector<1x8x8xf32>
    %125 = vector.shape_cast %124 : vector<1x8x8xf32> to vector<8x8xf32>
    %126 = arith.truncf %125 : vector<8x8xf32> to vector<8x8xbf16>
    %c0_44 = arith.constant 0 : index
    %c0_45 = arith.constant 0 : index
    %c0_46 = arith.constant 0 : index
    %c0_47 = arith.constant 0 : index
    %127 = vector.load %arg4[%c0_44, %c0_45, %c0_46, %c0_47] : memref<1x4x8x32xbf16, #tpu.memory_space<vmem>>, vector<1x1x8x32xbf16>
    %128 = vector.shape_cast %127 : vector<1x1x8x32xbf16> to vector<8x32xbf16>
    %cst_48 = arith.constant dense<0.000000e+00> : vector<8x32xf32>
    %129 = tpu.matmul %126, %128, %cst_48 {dimension_numbers = #tpu.dot_dimension_numbers<[1], [0], [0], [1], [0, 0, 1, 1], [], []>} : vector<8x8xbf16>, vector<8x32xbf16>, vector<8x32xf32> -> vector<8x32xf32>
    %130 = vector.extract_strided_slice %96 {offsets = [5, 0, 0], sizes = [1, 8, 8], strides = [1, 1, 1]} : vector<8x8x8xf32> to vector<1x8x8xf32>
    %131 = vector.shape_cast %130 : vector<1x8x8xf32> to vector<8x8xf32>
    %132 = arith.truncf %131 : vector<8x8xf32> to vector<8x8xbf16>
    %c0_49 = arith.constant 0 : index
    %c1_50 = arith.constant 1 : index
    %c0_51 = arith.constant 0 : index
    %c0_52 = arith.constant 0 : index
    %133 = vector.load %arg4[%c0_49, %c1_50, %c0_51, %c0_52] : memref<1x4x8x32xbf16, #tpu.memory_space<vmem>>, vector<1x1x8x32xbf16>
    %134 = vector.shape_cast %133 : vector<1x1x8x32xbf16> to vector<8x32xbf16>
    %cst_53 = arith.constant dense<0.000000e+00> : vector<8x32xf32>
    %135 = tpu.matmul %132, %134, %cst_53 {dimension_numbers = #tpu.dot_dimension_numbers<[1], [0], [0], [1], [0, 0, 1, 1], [], []>} : vector<8x8xbf16>, vector<8x32xbf16>, vector<8x32xf32> -> vector<8x32xf32>
    %136 = arith.addf %129, %135 : vector<8x32xf32>
    %137 = vector.extract_strided_slice %96 {offsets = [6, 0, 0], sizes = [1, 8, 8], strides = [1, 1, 1]} : vector<8x8x8xf32> to vector<1x8x8xf32>
    %138 = vector.shape_cast %137 : vector<1x8x8xf32> to vector<8x8xf32>
    %139 = arith.truncf %138 : vector<8x8xf32> to vector<8x8xbf16>
    %c0_54 = arith.constant 0 : index
    %c2_55 = arith.constant 2 : index
    %c0_56 = arith.constant 0 : index
    %c0_57 = arith.constant 0 : index
    %140 = vector.load %arg4[%c0_54, %c2_55, %c0_56, %c0_57] : memref<1x4x8x32xbf16, #tpu.memory_space<vmem>>, vector<1x1x8x32xbf16>
    %141 = vector.shape_cast %140 : vector<1x1x8x32xbf16> to vector<8x32xbf16>
    %cst_58 = arith.constant dense<0.000000e+00> : vector<8x32xf32>
    %142 = tpu.matmul %139, %141, %cst_58 {dimension_numbers = #tpu.dot_dimension_numbers<[1], [0], [0], [1], [0, 0, 1, 1], [], []>} : vector<8x8xbf16>, vector<8x32xbf16>, vector<8x32xf32> -> vector<8x32xf32>
    %143 = arith.addf %136, %142 : vector<8x32xf32>
    %144 = vector.extract_strided_slice %96 {offsets = [7, 0, 0], sizes = [1, 8, 8], strides = [1, 1, 1]} : vector<8x8x8xf32> to vector<1x8x8xf32>
    %145 = vector.shape_cast %144 : vector<1x8x8xf32> to vector<8x8xf32>
    %146 = arith.truncf %145 : vector<8x8xf32> to vector<8x8xbf16>
    %c0_59 = arith.constant 0 : index
    %c3_60 = arith.constant 3 : index
    %c0_61 = arith.constant 0 : index
    %c0_62 = arith.constant 0 : index
    %147 = vector.load %arg4[%c0_59, %c3_60, %c0_61, %c0_62] : memref<1x4x8x32xbf16, #tpu.memory_space<vmem>>, vector<1x1x8x32xbf16>
    %148 = vector.shape_cast %147 : vector<1x1x8x32xbf16> to vector<8x32xbf16>
    %cst_63 = arith.constant dense<0.000000e+00> : vector<8x32xf32>
    %149 = tpu.matmul %146, %148, %cst_63 {dimension_numbers = #tpu.dot_dimension_numbers<[1], [0], [0], [1], [0, 0, 1, 1], [], []>} : vector<8x8xbf16>, vector<8x32xbf16>, vector<8x32xf32> -> vector<8x32xf32>
    %150 = arith.addf %143, %149 : vector<8x32xf32>
    %151 = tpu.concatenate %123, %150 in 0 : vector<8x32xf32>, vector<8x32xf32> -> vector<16x32xf32>
    %152 = vector.extract_strided_slice %5 {offsets = [3, 0], sizes = [1, 32], strides = [1, 1]} : vector<16x128xf32> to vector<1x32xf32>
    %153 = vector.broadcast %152 : vector<1x32xf32> to vector<16x32xf32>
    %154 = arith.addf %151, %153 : vector<16x32xf32>
    %155 = arith.addf %154, %3 : vector<16x32xf32>
    %156 = vector.extract_strided_slice %5 {offsets = [6, 0], sizes = [1, 32], strides = [1, 1]} : vector<16x128xf32> to vector<1x32xf32>
    %157 = vector.extract_strided_slice %5 {offsets = [7, 0], sizes = [1, 32], strides = [1, 1]} : vector<16x128xf32> to vector<1x32xf32>
    %cst_64 = arith.constant dense<0.000000e+00> : vector<16xf32>
    %158 = vector.multi_reduction <add>, %155, %cst_64 [1] : vector<16x32xf32> to vector<16xf32>
    %159 = vector.shape_cast %158 : vector<16xf32> to vector<16x1xf32>
    %cst_65 = arith.constant 3.200000e+01 : f32
    %160 = vector.broadcast %cst_65 : f32 to vector<16x1xf32>
    %161 = arith.divf %159, %160 : vector<16x1xf32>
    %162 = vector.broadcast %161 : vector<16x1xf32> to vector<16x32xf32>
    %163 = arith.subf %155, %162 : vector<16x32xf32>
    %164 = arith.mulf %163, %163 : vector<16x32xf32>
    %cst_66 = arith.constant dense<0.000000e+00> : vector<16xf32>
    %165 = vector.multi_reduction <add>, %164, %cst_66 [1] : vector<16x32xf32> to vector<16xf32>
    %166 = vector.shape_cast %165 : vector<16xf32> to vector<16x1xf32>
    %cst_67 = arith.constant 3.200000e+01 : f32
    %167 = vector.broadcast %cst_67 : f32 to vector<16x1xf32>
    %168 = arith.divf %166, %167 : vector<16x1xf32>
    %cst_68 = arith.constant 9.99999996E-13 : f32
    %169 = vector.broadcast %cst_68 : f32 to vector<16x1xf32>
    %170 = arith.addf %168, %169 : vector<16x1xf32>
    %171 = math.rsqrt %170 : vector<16x1xf32>
    %172 = vector.broadcast %171 : vector<16x1xf32> to vector<16x32xf32>
    %173 = arith.mulf %163, %172 : vector<16x32xf32>
    %174 = vector.broadcast %156 : vector<1x32xf32> to vector<16x32xf32>
    %175 = arith.mulf %173, %174 : vector<16x32xf32>
    %176 = vector.broadcast %157 : vector<1x32xf32> to vector<16x32xf32>
    %177 = arith.addf %175, %176 : vector<16x32xf32>
    %178 = arith.truncf %177 : vector<16x32xf32> to vector<16x32xbf16>
    %c0_69 = arith.constant 0 : index
    %c0_70 = arith.constant 0 : index
    %c0_71 = arith.constant 0 : index
    %179 = vector.load %arg5[%c0_69, %c0_70, %c0_71] : memref<1x32x128xbf16, #tpu.memory_space<vmem>>, vector<1x32x128xbf16>
    %180 = vector.shape_cast %179 : vector<1x32x128xbf16> to vector<32x128xbf16>
    %cst_72 = arith.constant dense<0.000000e+00> : vector<16x128xf32>
    %181 = tpu.matmul %178, %180, %cst_72 {dimension_numbers = #tpu.dot_dimension_numbers<[1], [0], [0], [1], [0, 0, 1, 1], [], []>} : vector<16x32xbf16>, vector<32x128xbf16>, vector<16x128xf32> -> vector<16x128xf32>
    %182 = vector.extract_strided_slice %5 {offsets = [4, 0], sizes = [1, 128], strides = [1, 1]} : vector<16x128xf32> to vector<1x128xf32>
    %183 = vector.broadcast %182 : vector<1x128xf32> to vector<16x128xf32>
    %184 = arith.addf %181, %183 : vector<16x128xf32>
    %cst_73 = arith.constant 5.000000e-01 : f32
    %185 = vector.broadcast %cst_73 : f32 to vector<16x128xf32>
    %186 = arith.mulf %185, %184 : vector<16x128xf32>
    %cst_74 = arith.constant 4.471500e-02 : f32
    %187 = vector.broadcast %cst_74 : f32 to vector<16x128xf32>
    %188 = arith.mulf %187, %184 : vector<16x128xf32>
    %189 = arith.mulf %188, %184 : vector<16x128xf32>
    %190 = arith.mulf %189, %184 : vector<16x128xf32>
    %191 = arith.addf %184, %190 : vector<16x128xf32>
    %cst_75 = arith.constant 0.797884583 : f32
    %192 = vector.broadcast %cst_75 : f32 to vector<16x128xf32>
    %193 = arith.mulf %192, %191 : vector<16x128xf32>
    %194 = math.tanh %193 : vector<16x128xf32>
    %cst_76 = arith.constant 1.000000e+00 : f32
    %195 = vector.broadcast %cst_76 : f32 to vector<16x128xf32>
    %196 = arith.addf %195, %194 : vector<16x128xf32>
    %197 = arith.mulf %186, %196 : vector<16x128xf32>
    %198 = arith.truncf %197 : vector<16x128xf32> to vector<16x128xbf16>
    %c0_77 = arith.constant 0 : index
    %c0_78 = arith.constant 0 : index
    %c0_79 = arith.constant 0 : index
    %199 = vector.load %arg6[%c0_77, %c0_78, %c0_79] : memref<1x128x32xbf16, #tpu.memory_space<vmem>>, vector<1x128x32xbf16>
    %200 = vector.shape_cast %199 : vector<1x128x32xbf16> to vector<128x32xbf16>
    %cst_80 = arith.constant dense<0.000000e+00> : vector<16x32xf32>
    %201 = tpu.matmul %198, %200, %cst_80 {dimension_numbers = #tpu.dot_dimension_numbers<[1], [0], [0], [1], [0, 0, 1, 1], [], []>} : vector<16x128xbf16>, vector<128x32xbf16>, vector<16x32xf32> -> vector<16x32xf32>
    %202 = vector.extract_strided_slice %5 {offsets = [5, 0], sizes = [1, 32], strides = [1, 1]} : vector<16x128xf32> to vector<1x32xf32>
    %203 = vector.broadcast %202 : vector<1x32xf32> to vector<16x32xf32>
    %204 = arith.addf %201, %203 : vector<16x32xf32>
    %205 = arith.addf %204, %177 : vector<16x32xf32>
    %206 = vector.extract_strided_slice %5 {offsets = [8, 0], sizes = [1, 32], strides = [1, 1]} : vector<16x128xf32> to vector<1x32xf32>
    %207 = vector.extract_strided_slice %5 {offsets = [9, 0], sizes = [1, 32], strides = [1, 1]} : vector<16x128xf32> to vector<1x32xf32>
    %cst_81 = arith.constant dense<0.000000e+00> : vector<16xf32>
    %208 = vector.multi_reduction <add>, %205, %cst_81 [1] : vector<16x32xf32> to vector<16xf32>
    %209 = vector.shape_cast %208 : vector<16xf32> to vector<16x1xf32>
    %cst_82 = arith.constant 3.200000e+01 : f32
    %210 = vector.broadcast %cst_82 : f32 to vector<16x1xf32>
    %211 = arith.divf %209, %210 : vector<16x1xf32>
    %212 = vector.broadcast %211 : vector<16x1xf32> to vector<16x32xf32>
    %213 = arith.subf %205, %212 : vector<16x32xf32>
    %214 = arith.mulf %213, %213 : vector<16x32xf32>
    %cst_83 = arith.constant dense<0.000000e+00> : vector<16xf32>
    %215 = vector.multi_reduction <add>, %214, %cst_83 [1] : vector<16x32xf32> to vector<16xf32>
    %216 = vector.shape_cast %215 : vector<16xf32> to vector<16x1xf32>
    %cst_84 = arith.constant 3.200000e+01 : f32
    %217 = vector.broadcast %cst_84 : f32 to vector<16x1xf32>
    %218 = arith.divf %216, %217 : vector<16x1xf32>
    %cst_85 = arith.constant 9.99999996E-13 : f32
    %219 = vector.broadcast %cst_85 : f32 to vector<16x1xf32>
    %220 = arith.addf %218, %219 : vector<16x1xf32>
    %221 = math.rsqrt %220 : vector<16x1xf32>
    %222 = vector.broadcast %221 : vector<16x1xf32> to vector<16x32xf32>
    %223 = arith.mulf %213, %222 : vector<16x32xf32>
    %224 = vector.broadcast %206 : vector<1x32xf32> to vector<16x32xf32>
    %225 = arith.mulf %223, %224 : vector<16x32xf32>
    %226 = vector.broadcast %207 : vector<1x32xf32> to vector<16x32xf32>
    %227 = arith.addf %225, %226 : vector<16x32xf32>
    %c0_86 = arith.constant 0 : index
    %c0_87 = arith.constant 0 : index
    %228 = vector.load %arg8[%c0_86, %c0_87] : memref<16x32xf32, #tpu.memory_space<vmem>>, vector<16x32xf32>
    tpu.vector_store %arg8[%c0_86, %c0_87], %227 {strides = array<i32>} : memref<16x32xf32, #tpu.memory_space<vmem>>, vector<16x32xf32>,
    return
  }
  func.func @transform_0(%arg0: i32) -> (i32, i32) {
    %c0_i32 = arith.constant 0 : i32
    %c0_i32_0 = arith.constant 0 : i32
    %c0_i32_1 = arith.constant 0 : i32
    return %c0_i32, %c0_i32_0 : i32, i32
  }
  func.func @transform_1(%arg0: i32) -> (i32, i32, i32) {
    %c0_i32 = arith.constant 0 : i32
    %c0_i32_0 = arith.constant 0 : i32
    %c0_i32_1 = arith.constant 0 : i32
    %c0_i32_2 = arith.constant 0 : i32
    return %c0_i32, %c0_i32_0, %c0_i32_1 : i32, i32, i32
  }
  func.func @transform_2(%arg0: i32) -> (i32, i32, i32, i32) {
    %c0_i32 = arith.constant 0 : i32
    %c0_i32_0 = arith.constant 0 : i32
    %c0_i32_1 = arith.constant 0 : i32
    %c0_i32_2 = arith.constant 0 : i32
    return %arg0, %c0_i32, %c0_i32_0, %c0_i32_1 : i32, i32, i32, i32
  }
  func.func @transform_3(%arg0: i32) -> (i32, i32, i32, i32) {
    %c0_i32 = arith.constant 0 : i32
    %c0_i32_0 = arith.constant 0 : i32
    %c0_i32_1 = arith.constant 0 : i32
    %c0_i32_2 = arith.constant 0 : i32
    return %arg0, %c0_i32, %c0_i32_0, %c0_i32_1 : i32, i32, i32, i32
  }
  func.func @transform_4(%arg0: i32) -> (i32, i32, i32) {
    %c0_i32 = arith.constant 0 : i32
    %c0_i32_0 = arith.constant 0 : i32
    %c0_i32_1 = arith.constant 0 : i32
    return %arg0, %c0_i32, %c0_i32_0 : i32, i32, i32
  }
  func.func @transform_5(%arg0: i32) -> (i32, i32, i32) {
    %c0_i32 = arith.constant 0 : i32
    %c0_i32_0 = arith.constant 0 : i32
    %c0_i32_1 = arith.constant 0 : i32
    return %arg0, %c0_i32, %c0_i32_0 : i32, i32, i32
  }
  func.func @transform_6(%arg0: i32) -> (i32, i32, i32) {
    %c0_i32 = arith.constant 0 : i32
    %c0_i32_0 = arith.constant 0 : i32
    %c0_i32_1 = arith.constant 0 : i32
    return %arg0, %c0_i32, %c0_i32_0 : i32, i32, i32
  }
  func.func @transform_7(%arg0: i32) -> (i32, i32) {
    %c0_i32 = arith.constant 0 : i32
    %c0_i32_0 = arith.constant 0 : i32
    %c0_i32_1 = arith.constant 0 : i32
    return %c0_i32, %c0_i32_0 : i32, i32
  }
}

</mosaic_0001>

<bundles_post_ra>
// kernel: bert_forward.1
= control target key start
LH: loop header
LB: loop body
LE: loop exit
PB: predicated region body
PF: predicated region fallthrough
CT: control target
= control target key end

     0   :  { %12 = vsyncpa [#allocation3], 0  ;;  %s2799_s24 = smov 0   ;;  %s3190_s0 = inlined_call_operand.vmem [shape: f32[16,32], index: 0, kind: input, shape index: {}]   ;;  %s3191_s1 = inlined_call_operand.vmem [shape: f32[8,1,8], index: 1, kind: input, shape index: {}]   ;;  %s3192_s2 = inlined_call_operand.vmem [shape: bf16[2,3,32,32], index: 2, kind: input, shape index: {}]   ;;  %s3193_s3 = inlined_call_operand.vmem [shape: bf16[2,4,8,32], index: 3, kind: input, shape index: {}]   ;;  %s3194_s4 = inlined_call_operand.vmem [shape: bf16[2,32,128], index: 4, kind: input, shape index: {}]   ;;  %s3195_s5 = inlined_call_operand.vmem [shape: bf16[2,128,32], index: 5, kind: input, shape index: {}]   ;;  %s3196_s6 = inlined_call_operand.vmem [shape: f32[2,16,128], index: 6, kind: input, shape index: {}]   ;;  %s3197_s7 = inlined_call_operand.hbm [shape: f32[16,32], index: 7, kind: output, shape index: {}]  }
   0x1 LB: > { %s2805_s25 = sadd.s32 4294967295, %s2749_s24   ;;  %p2281_p0 = scmp.ge.s32.totalorder %s2749_s24, 1  ;;  %s2749_s24 = sphi %s2799_s24, %s18_s24  }
   0x2   : > { %p273_p1 = scmp.lt.s32.totalorder %s2749_s24, 3 }
   0x4   : > { %p274_p2 = pnand %p2281_p0, %p273_p1 }
   0x5   : > { %p320_p3 = scmp.lt.s32.totalorder (!%p274_p2), %s2805_s25, 1  ;;  %p2291_p4 = scmp.ne.s32.totalorder (!%p274_p2), %s2805_s25, 0 }
   0x6   : > { %277 = sbr.rel (%p274_p2) target bundleno = 2481 (0x9b1), region = 48 }
   0xd   : > { %s321_s26 = scalar_select %p320_p3, %s2805_s25, 1 }
   0xe   : > { %349 = sbr.rel (%p2291_p4) target bundleno = 21 (0x15), region = 52  ;;  %v350_v0 = vld [vmem:[%s3190_s0] sm:$0xff] (!%p2291_p4)  ;;  %vm352_vm0 = vcmask (!%p2291_p4), 261120   ;;  %v351_v1 = vld [vmem:[%s3190_s0 + $0x8] sm:$0xff] (!%p2291_p4) }
   0xf   : > { %s2628_s27 = smul.u32 48, %s321_s26  ;;  %s2359_s28 = sshll.u32 %s321_s26, 4  ;;  %353 = vst.msk [vmem:[#allocation2] sm:$0xff] (!%p2291_p4), %vm352_vm0, %v350_v0  ;;  %354 = vst.msk [vmem:[#allocation2 + $0x8] sm:$0xff] (!%p2291_p4), %vm352_vm0, %v351_v1 }
  0x10   : > { %s2814_s8 = scalar_lea.vmem %s3193_s3, %s2359_s28  ;;  %s2819_s11 = scalar_lea.vmem %s3194_s4, %s2359_s28 }
  0x11   : > { %s2824_s14 = scalar_lea.vmem %s3192_s2, %s2628_s27  ;;  %s2361_s15 = sshll.u32 %s321_s26, 6 }
  0x12   : > { %s2829_s18 = scalar_lea.vmem %s3195_s5, %s2361_s15  ;;  %s2834_s21 = scalar_lea.vmem %s3196_s6, %s2359_s28 }
  0x15 PF: > { %v2651_v2 = vld [vmem:[%s2824_s14] sm:$0xff]   ;;  %v2751_v3 = vmov 0.0   ;;  %v2652_v4 = vld [vmem:[%s2824_s14 + $0x8] sm:$0xff]   ;;  %vm2752_vm1 = vmmov 0   ;;  %vm380_vm2 = vcmask 261120   ;;  %v2653_v8 = vld [vmem:[%s2824_s14 + $0x10] sm:$0xff]   ;;  %v364_v12 = vlaneseq }
  0x16   : > { %2432 = vmatprep.subr.bf16.mxu1 %v2751_v3  ;;  %2462 = vmatprep.subr.bf16.mxu0 %v2751_v3  ;;  %v2849_v5 = vld [vmem:[#allocation2] sm:$0xff]  ;;  %v356_v6 = vld [vmem:[#allocation2 + $0x8] sm:$0xff]  ;;  %v2654_v9 = vld [vmem:[%s2824_s14 + $0x18] sm:$0xff]   ;;  %vm691_vm3 = vcmask 64512   ;;  %s2753_s28 = smov 112   ;;  %s2754_s29 = smov 120  }
  0x17   : > { %2433 = vmatpush3.bf16.msra.mxu1 %v2651_v2  ;;  %2436 = vmatprep.mubr.msk.bf16.mxu1 %vm2752_vm1, %v2751_v3  ;;  %v359_v7 = vpack.c.bf16 %v356_v6, %v2849_v5  ;;  %v2655_v10 = vld [vmem:[%s2824_s14 + $0x20] sm:$0xff]   ;;  %v2656_v11 = vld [vmem:[%s2824_s14 + $0x28] sm:$0xff]   ;;  %v2873_v13 = vshrl.u32 %v364_v12, 7  ;;  %s2755_s30 = smov 104   ;;  %vm1159_vm4 = vcmask 1043456   ;;  %p2633_p5 = scmp.eq.s32.totalorder %s2805_s25, 1 }
  0x18   : > { %2434 = vmatprep.subr.bf16.mxu1 %v2751_v3  ;;  %2464 = vmatprep.mubr.msk.bf16.mxu0 %vm2752_vm1, %v2751_v3  ;;  %v2878_v18 = vld [vmem:[%s2834_s21] sm:$0xff] }
  0x19   : > { %v366_v15 = vsub.s32 0, %v2873_v13  ;;  %v434_v17 = vsub.s32 1, %v2873_v13  ;;  %v496_v36 = vsub.s32 2, %v2873_v13 }
  0x1b   : > { %2435 = vmatpush3.bf16.msra.mxu1 %v2652_v4  ;;  %v367_v21 = vrot.slane %v2878_v18, %v366_v15  ;;  %v435_v22 = vrot.slane %v2878_v18, %v434_v17  ;;  %v497_v37 = vrot.slane %v2878_v18, %v496_v36 }
  0x1c   : > { %2440 = vmatprep.subr.bf16.mxu1 %v2751_v3 }
  0x1e   : > { %2437 = vmatmul.mubr.msk.bf16.vlgmr.msra.gmra.mrb[0].mxu1 %vm380_vm2, %v359_v7 }
  0x1f   : > { %2441 = vmatpush3.bf16.msra.mxu1 %v2653_v8  ;;  %2444 = vmatprep.mubr.msk.bf16.mxu1 %vm2752_vm1, %v2751_v3 }
  0x20   : > { %2442 = vmatprep.subr.bf16.mxu1 %v2751_v3 }
  0x23   : > { %2443 = vmatpush3.bf16.msra.mxu1 %v2654_v9 }
  0x24   : > { %2448 = vmatprep.subr.bf16.mxu1 %v2751_v3 }
  0x26   : > { %2445 = vmatmul.mubr.msk.bf16.vlgmr.msra.gmra.mrb[4].mxu1 %vm380_vm2, %v359_v7 }
  0x27   : > { %2452 = vmatprep.mubr.msk.bf16.mxu1 %vm2752_vm1, %v2751_v3  ;;  %2449 = vmatpush3.bf16.msra.mxu1 %v2655_v10 }
  0x28   : > { %2450 = vmatprep.subr.bf16.mxu1 %v2751_v3 }
  0x2b   : > { %2451 = vmatpush3.bf16.msra.mxu1 %v2656_v11 }
  0x2c   : > { %2456 = vmatprep.subr.bf16.mxu1 %v2751_v3 }
  0x2e   : > { %2453 = vmatmul.mubr.msk.bf16.vlgmr.msra.gmra.mrb[8].mxu1 %vm380_vm2, %v359_v7 }
  0x2f   : > { %2458 = vmatprep.mubr.msk.bf16.mxu1 %vm2752_vm1, %v2751_v3 }
  0xf1   : > { %v418_v14 = vpop.f32.mrb[0].mxu1 }
  0xf2   : > { %v2438_v16 = vpop.f32.mrb[1].mxu1  ;;  %v419_v24 = vadd.f32 %v418_v14, %v367_v21 }
  0xf3   : > { %v421_v19 = vpop.f32.mrb[2].mxu1 }
  0xf4   : > { %v2439_v20 = vpop.f32.mrb[3].mxu1  ;;  %v425_v30 = vmul.f32 0.35355338, %v419_v24  ;;  %v422_v32 = vadd.f32 %v421_v19, %v367_v21  ;;  %v2309_v21 = vld [vmem:[%s3191_s1] ss:$0 sm:$0xff] }
  0xf6   : > { %v571_v33 = vpack.c.bf16 %v425_v30, %v425_v30  ;;  %v426_v34 = vmul.f32 0.35355338, %v422_v32 }
  0xf8   : > { %v575_v63 = vpack.c.bf16 %v426_v34, %v426_v34 }
  0xf9   : > { %v482_v23 = vpop.f32.mrb[4].mxu1 }
  0xfa   : > { %v483_v25 = vadd.f32 %v482_v23, %v435_v22  ;;  %v2446_v26 = vpop.f32.mrb[5].mxu1 }
  0xfb   : > { %v485_v27 = vpop.f32.mrb[6].mxu1 }
  0xfc   : > { %583 = vrot.lane.b32.xlu1 %v483_v25, %s2753_s28  ;;  %580 = vrot.lane.b32.xlu0 %v483_v25, %s2754_s29  ;;  %v2447_v28 = vpop.f32.mrb[7].mxu1  ;;  %v599_v29 = vpack.c.bf16 %v483_v25, %v483_v25  ;;  %v486_v35 = vadd.f32 %v485_v27, %v435_v22 }
  0xfd   : > { %v2310_v28 = vld [vmem:[%s3191_s1 + $0x1] ss:$0 sm:$0xff] }
  0xfe   : > { %v696_v31 = vsel %vm691_vm3, %v599_v29, 0  ;;  %v603_v52 = vpack.c.bf16 %v486_v35, %v486_v35  ;;  %v2311_v29 = vld [vmem:[%s3191_s1 + $0x2] ss:$0 sm:$0xff] }
  0xff   : > { %2457 = vmatpush3.bf16.xpose.msra.mxu1 %v696_v31 }
 0x100   : > { %586 = vrot.lane.b32.xlu1 %v483_v25, %s2755_s30  ;;  %552 = vrot.lane.b32.xlu0 %v425_v30, %s2754_s29  ;;  %v880_v58 = vsel %vm691_vm3, %v603_v52, 0 }
 0x101   : > { %2468 = vmatprep.subr.bf16.mxu1 %v2751_v3  ;;  %v544_v38 = vpop.f32.mrb[8].mxu1 }
 0x102   : > { %v2454_v39 = vpop.f32.mrb[9].mxu1  ;;  %v2921_v2 = vadd.f32 %v544_v38, %v497_v37 }
 0x103   : > { %v547_v40 = vpop.f32.mrb[10].mxu1 }
 0x104   : > { %558 = vrot.lane.b32.xlu1 %v425_v30, %s2755_s30  ;;  %555 = vrot.lane.b32.xlu0 %v425_v30, %s2753_s28  ;;  %v2905_v41 = vadd.f32 %v547_v40, %v497_v37  ;;  %v2455_v42 = vpop.f32.mrb[11].mxu1  ;;  %v627_v9 = vpack.c.bf16 %v2921_v2, %v2921_v2 }
 0x106   : > { %2459 = vmatmul.mubr.msk.bf16.vlgmr.msra.gmra.mrb[12].mxu1 %vm691_vm3, %v571_v33  ;;  %v1161_v14 = vsel %vm1159_vm4, %v627_v9, 0 }
 0x107   : > { %2470 = vmatprep.mubr.msk.bf16.mxu1 %vm2752_vm1, %v2751_v3 }
 0x108   : > { %562 = vrot.lane.b32.xlu1 %v426_v34, %s2754_s29  ;;  %590 = vrot.lane.b32.xlu0 %v486_v35, %s2754_s29 }
 0x10c   : > { %596 = vrot.lane.b32.xlu1 %v486_v35, %s2755_s30  ;;  %593 = vrot.lane.b32.xlu0 %v486_v35, %s2753_s28 }
 0x110   : > { %568 = vrot.lane.b32.xlu1 %v426_v34, %s2755_s30  ;;  %565 = vrot.lane.b32.xlu0 %v426_v34, %s2753_s28 }
 0x16e   : > { %v584_v43 = vpop.permute.xlu1 %583  ;;  %v581_v44 = vpop.permute.xlu0 %580 }
 0x16f   : > { %v601_v45 = vpack.c.bf16 %v584_v43, %v584_v43  ;;  %v600_v46 = vpack.c.bf16 %v581_v44, %v581_v44  ;;  %v2312_v43 = vld [vmem:[%s3191_s1 + $0x3] ss:$0 sm:$0xff]  ;;  %v2313_v44 = vld [vmem:[%s3191_s1 + $0x4] ss:$0 sm:$0xff] }
 0x171   : > { %v788_v47 = vsel %vm691_vm3, %v601_v45, 0  ;;  %v742_v48 = vsel %vm691_vm3, %v600_v46, 0 }
 0x172   : > { %v587_v49 = vpop.permute.xlu1 %586  ;;  %2463 = vmatpush3.bf16.xpose.msra.mxu0 %v742_v48  ;;  %v553_v50 = vpop.permute.xlu0 %552  ;;  %2469 = vmatpush3.bf16.xpose.msra.mxu1 %v788_v47 }
 0x173   : > { %2474 = vmatprep.subr.bf16.mxu0 %v2751_v3  ;;  %2480 = vmatprep.subr.bf16.mxu1 %v2751_v3  ;;  %v602_v51 = vpack.c.bf16 %v587_v49, %v587_v49  ;;  %v572_v55 = vpack.c.bf16 %v553_v50, %v553_v50 }
 0x175   : > { %v834_v57 = vsel %vm691_vm3, %v602_v51, 0 }
 0x176   : > { %v559_v53 = vpop.permute.xlu1 %558  ;;  %v556_v54 = vpop.permute.xlu0 %555 }
 0x177   : > { %v573_v56 = vpack.c.bf16 %v556_v54, %v556_v54  ;;  %v574_v0 = vpack.c.bf16 %v559_v53, %v559_v53 }
 0x179   : > { %2465 = vmatmul.mubr.msk.bf16.vlgmr.msra.gmra.mrb[0].mxu0 %vm691_vm3, %v572_v55  ;;  %2471 = vmatmul.mubr.msk.bf16.vlgmr.msra.gmra.mrb[16].mxu1 %vm691_vm3, %v573_v56 }
 0x17a   : > { %2475 = vmatpush3.bf16.xpose.msra.mxu0 %v834_v57  ;;  %v591_v59 = vpop.permute.xlu0 %590  ;;  %2481 = vmatpush3.bf16.xpose.msra.mxu1 %v880_v58  ;;  %v563_v60 = vpop.permute.xlu1 %562  ;;  %v2314_v57 = vld [vmem:[%s3191_s1 + $0x5] ss:$0 sm:$0xff]  ;;  %v2315_v58 = vld [vmem:[%s3191_s1 + $0x6] ss:$0 sm:$0xff] }
 0x17b   : > { %2476 = vmatprep.mubr.msk.bf16.mxu0 %vm2752_vm1, %v2751_v3  ;;  %2482 = vmatprep.mubr.msk.bf16.mxu1 %vm2752_vm1, %v2751_v3  ;;  %v604_v61 = vpack.c.bf16 %v591_v59, %v591_v59  ;;  %v576_v11 = vpack.c.bf16 %v563_v60, %v563_v60 }
 0x17c   : > { %2486 = vmatprep.subr.bf16.mxu0 %v2751_v3  ;;  %2492 = vmatprep.subr.bf16.mxu1 %v2751_v3 }
 0x17d   : > { %v926_v4 = vsel %vm691_vm3, %v604_v61, 0 }
 0x17e   : > { %v594_v62 = vpop.permute.xlu0 %593  ;;  %v597_v7 = vpop.permute.xlu1 %596 }
 0x17f   : > { %v605_v1 = vpack.c.bf16 %v594_v62, %v594_v62  ;;  %v606_v10 = vpack.c.bf16 %v597_v7, %v597_v7 }
 0x181   : > { %v972_v6 = vsel %vm691_vm3, %v605_v1, 0  ;;  %2477 = vmatmul.mubr.msk.bf16.vlgmr.msra.gmra.mrb[4].mxu0 %vm691_vm3, %v574_v0  ;;  %2483 = vmatmul.mubr.msk.bf16.vlgmr.msra.gmra.mrb[20].mxu1 %vm691_vm3, %v575_v63  ;;  %v1018_v16 = vsel %vm691_vm3, %v606_v10, 0  ;;  %v2316_v10 = vld [vmem:[%s3191_s1 + $0x7] ss:$0 sm:$0xff] }
 0x182   : > { %2487 = vmatpush3.bf16.xpose.msra.mxu0 %v926_v4  ;;  %2493 = vmatpush3.bf16.xpose.msra.mxu1 %v972_v6  ;;  %v566_v8 = vpop.permute.xlu0 %565  ;;  %v569_v19 = vpop.permute.xlu1 %568 }
 0x183   : > { %2488 = vmatprep.mubr.msk.bf16.mxu0 %vm2752_vm1, %v2751_v3  ;;  %2494 = vmatprep.mubr.msk.bf16.mxu1 %vm2752_vm1, %v2751_v3  ;;  %v577_v12 = vpack.c.bf16 %v566_v8, %v566_v8  ;;  %v578_v20 = vpack.c.bf16 %v569_v19, %v569_v19 }
 0x184   : > { %2498 = vmatprep.subr.bf16.mxu0 %v2751_v3  ;;  %2504 = vmatprep.subr.bf16.mxu1 %v2751_v3 }
 0x189   : > { %2489 = vmatmul.mubr.msk.bf16.vlgmr.msra.gmra.mrb[8].mxu0 %vm691_vm3, %v576_v11  ;;  %2495 = vmatmul.mubr.msk.bf16.vlgmr.msra.gmra.mrb[24].mxu1 %vm691_vm3, %v577_v12 }
 0x18a   : > { %2499 = vmatpush3.bf16.xpose.msra.mxu0 %v1018_v16  ;;  %2500 = vmatprep.mubr.msk.bf16.mxu0 %vm2752_vm1, %v2751_v3 }
 0x18b   : > { %2505 = vmatpush3.bf16.msra.mxu1 %v1161_v14  ;;  %2510 = vmatprep.subr.bf16.mxu0 %v2751_v3 }
 0x18c   : > { %2506 = vmatprep.mubr.msk.bf16.mxu1 %vm2752_vm1, %v2751_v3  ;;  %2516 = vmatprep.subr.bf16.mxu1 %v2751_v3 }
 0x191   : > { %2501 = vmatmul.mubr.msk.bf16.vlgmr.msra.gmra.mrb[12].mxu0 %vm691_vm3, %v578_v20 }
 0x192   : > { %2512 = vmatprep.mubr.msk.bf16.mxu0 %vm2752_vm1, %v2751_v3 }
 0x1d9   : > { %v732_v22 = vpop.f32.mrb[12].mxu1 }
 0x1da   : > { %v2951_v23 = vadd.f32 %v2309_v21, %v732_v22  ;;  %v2460_v24 = vpop.f32.mrb[13].mxu1 }
 0x1db   : > { %v735_v25 = vpop.f32.mrb[14].mxu1 }
 0x1dc   : > { %v2461_v26 = vpop.f32.mrb[15].mxu1  ;;  %v1060_v27 = vsel %vm691_vm3, %v2951_v23, -inf }
 0x1dd   : > { %1061 = vmax.xlane.f32.xlu0 %v1060_v27 }
 0x24c   : > { %v778_v30 = vpop.f32.mrb[0].mxu0  ;;  %v824_v31 = vpop.f32.mrb[16].mxu1 }
 0x24d   : > { %v2961_v32 = vadd.f32 %v2310_v28, %v778_v30  ;;  %v2963_v33 = vadd.f32 %v2311_v29, %v824_v31  ;;  %v2466_v34 = vpop.f32.mrb[1].mxu0  ;;  %v2472_v35 = vpop.f32.mrb[17].mxu1 }
 0x24e   : > { %v781_v36 = vpop.f32.mrb[2].mxu0  ;;  %v827_v37 = vpop.f32.mrb[18].mxu1 }
 0x24f   : > { %v2467_v38 = vpop.f32.mrb[3].mxu0  ;;  %v2473_v39 = vpop.f32.mrb[19].mxu1  ;;  %v1063_v40 = vsel %vm691_vm3, %v2961_v32, -inf  ;;  %v1066_v42 = vsel %vm691_vm3, %v2963_v33, -inf }
 0x250   : > { %1064 = vmax.xlane.f32.xlu1 %v1063_v40  ;;  %1067 = vmax.xlane.f32.xlu0 %v1066_v42 }
 0x254   : > { %v870_v45 = vpop.f32.mrb[4].mxu0  ;;  %v916_v46 = vpop.f32.mrb[20].mxu1 }
 0x255   : > { %v871_v47 = vadd.f32 %v2312_v43, %v870_v45  ;;  %v917_v48 = vadd.f32 %v2313_v44, %v916_v46  ;;  %v2478_v49 = vpop.f32.mrb[5].mxu0  ;;  %v2484_v50 = vpop.f32.mrb[21].mxu1 }
 0x256   : > { %v873_v51 = vpop.f32.mrb[6].mxu0  ;;  %v919_v52 = vpop.f32.mrb[22].mxu1 }
 0x257   : > { %v2479_v53 = vpop.f32.mrb[7].mxu0  ;;  %v2485_v54 = vpop.f32.mrb[23].mxu1  ;;  %v1069_v55 = vsel %vm691_vm3, %v871_v47, -inf  ;;  %v1072_v56 = vsel %vm691_vm3, %v917_v48, -inf }
 0x258   : > { %1070 = vmax.xlane.f32.xlu0 %v1069_v55  ;;  %1073 = vmax.xlane.f32.xlu1 %v1072_v56 }
 0x25c   : > { %v962_v59 = vpop.f32.mrb[8].mxu0  ;;  %v1008_v60 = vpop.f32.mrb[24].mxu1 }
 0x25d   : > { %v963_v61 = vadd.f32 %v2314_v57, %v962_v59  ;;  %v1009_v62 = vadd.f32 %v2315_v58, %v1008_v60  ;;  %v2490_v63 = vpop.f32.mrb[9].mxu0  ;;  %v2496_v0 = vpop.f32.mrb[25].mxu1 }
 0x25e   : > { %v965_v1 = vpop.f32.mrb[10].mxu0  ;;  %v1011_v4 = vpop.f32.mrb[26].mxu1 }
 0x25f   : > { %v2491_v6 = vpop.f32.mrb[11].mxu0  ;;  %v2497_v7 = vpop.f32.mrb[27].mxu1  ;;  %v1075_v8 = vsel %vm691_vm3, %v963_v61, -inf  ;;  %v1078_v9 = vsel %vm691_vm3, %v1009_v62, -inf }
 0x260   : > { %1076 = vmax.xlane.f32.xlu0 %v1075_v8  ;;  %1079 = vmax.xlane.f32.xlu1 %v1078_v9 }
 0x264   : > { %v1054_v11 = vpop.f32.mrb[12].mxu0 }
 0x265   : > { %v1055_v12 = vadd.f32 %v2316_v10, %v1054_v11  ;;  %v2502_v14 = vpop.f32.mrb[13].mxu0 }
 0x266   : > { %v1057_v16 = vpop.f32.mrb[14].mxu0 }
 0x267   : > { %v2503_v19 = vpop.f32.mrb[15].mxu0  ;;  %v1081_v20 = vsel %vm691_vm3, %v1055_v12, -inf }
 0x268   : > { %1082 = vmax.xlane.f32.xlu0 %v1081_v20 }
 0x26a   : > { %v1062_v21 = vpop.xlane.xlu0 %1061 }
 0x26b   : > { %v1084_v22 = vsub.f32 %v2951_v23, %v1062_v21 }
 0x26d   : > { %v1092_v24 = vmul.f32 1.442695, %v1084_v22 }
 0x26f   : > { %2667 = vpow2.f32 %v1092_v24 }
 0x271   : > { %608 = vrot.lane.b32.xlu1 %v2921_v2, %s2754_s29 }
 0x279   : > { %v2992_v25 = vpop.eup %2667 }
 0x27a   : > { %v1108_v26 = vsel %vm691_vm3, %v2992_v25, 0.0 }
 0x295   : > { %1109 = vadd.xlane.f32.xlu1 %v1108_v26 }
 0x2dd   : > { %v1065_v27 = vpop.xlane.xlu1 %1064  ;;  %v1068_v28 = vpop.xlane.xlu0 %1067 }
 0x2de   : > { %v1085_v29 = vsub.f32 %v2961_v32, %v1065_v27  ;;  %v1086_v30 = vsub.f32 %v2963_v33, %v1068_v28 }
 0x2e0   : > { %v1094_v31 = vmul.f32 1.442695, %v1085_v29  ;;  %v1096_v34 = vmul.f32 1.442695, %v1086_v30 }
 0x2e2   : > { %2669 = vpow2.f32 %v1094_v31 }
 0x2e3   : > { %2671 = vpow2.f32 %v1096_v34 }
 0x2e5   : > { %v1071_v35 = vpop.xlane.xlu0 %1070  ;;  %v1074_v23 = vpop.xlane.xlu1 %1073 }
 0x2e6   : > { %v1087_v36 = vsub.f32 %v871_v47, %v1071_v35  ;;  %v1088_v37 = vsub.f32 %v917_v48, %v1074_v23 }
 0x2e8   : > { %v1098_v38 = vmul.f32 1.442695, %v1087_v36  ;;  %v1100_v39 = vmul.f32 1.442695, %v1088_v37 }
 0x2ea   : > { %2673 = vpow2.f32 %v1098_v38 }
 0x2eb   : > { %2675 = vpow2.f32 %v1100_v39 }
 0x2ec   : > { %v2670_v40 = vpop.eup %2669 }
 0x2ed   : > { %v2998_v42 = vpop.eup %2671  ;;  %v1077_v43 = vpop.xlane.xlu0 %1076  ;;  %v1111_v32 = vsel %vm691_vm3, %v2670_v40, 0.0 }
 0x2ee   : > { %v1080_v44 = vpop.xlane.xlu1 %1079  ;;  %v1089_v33 = vsub.f32 %v963_v61, %v1077_v43  ;;  %1112 = vadd.xlane.f32.xlu0 %v1111_v32  ;;  %v1114_v46 = vsel %vm691_vm3, %v2998_v42, 0.0  ;;  %v631_v32 = vpack.c.bf16 %v2905_v41, %v2905_v41 }
 0x2ef   : > { %v1090_v45 = vsub.f32 %v1009_v62, %v1080_v44  ;;  %1115 = vadd.xlane.f32.xlu1 %v1114_v46 }
 0x2f0   : > { %v1102_v47 = vmul.f32 1.442695, %v1089_v33 }
 0x2f1   : > { %v1104_v48 = vmul.f32 1.442695, %v1090_v45 }
 0x2f2   : > { %v609_v49 = vpop.permute.xlu1 %608  ;;  %2677 = vpow2.f32 %v1102_v47  ;;  %v1526_v47 = vld [vmem:[%s2814_s8] sm:$0xf] }
 0x2f3   : > { %v628_v50 = vpack.c.bf16 %v609_v49, %v609_v49  ;;  %2679 = vpow2.f32 %v1104_v48 }
 0x2f4   : > { %v2674_v51 = vpop.eup %2673 }
 0x2f5   : > { %v1207_v52 = vsel %vm1159_vm4, %v628_v50, 0  ;;  %v3004_v53 = vpop.eup %2675  ;;  %v1083_v54 = vpop.xlane.xlu0 %1082  ;;  %v1117_v55 = vsel %vm691_vm3, %v2674_v51, 0.0 }
 0x2f6   : > { %2511 = vmatpush3.bf16.msra.mxu0 %v1207_v52  ;;  %v1091_v56 = vsub.f32 %v1055_v12, %v1083_v54  ;;  %1118 = vadd.xlane.f32.xlu0 %v1117_v55  ;;  %v1120_v57 = vsel %vm691_vm3, %v3004_v53, 0.0 }
 0x2f7   : > { %2522 = vmatprep.subr.bf16.mxu0 %v2751_v3  ;;  %1121 = vadd.xlane.f32.xlu1 %v1120_v57 }
 0x2f8   : > { %v1106_v58 = vmul.f32 1.442695, %v1091_v56 }
 0x2fa   : > { %2681 = vpow2.f32 %v1106_v58  ;;  %v2333_v58 = vld [vmem:[%s2814_s8 + $0x4] sm:$0xf] }
 0x2fc   : > { %v2678_v59 = vpop.eup %2677 }
 0x2fd   : > { %v1123_v60 = vsel %vm691_vm3, %v2678_v59, 0.0  ;;  %v3011_v61 = vpop.eup %2679 }
 0x2fe   : > { %1124 = vadd.xlane.f32.xlu0 %v1123_v60  ;;  %v1126_v62 = vsel %vm691_vm3, %v3011_v61, 0.0  ;;  %v2338_v60 = vld [vmem:[%s2814_s8 + $0xc] sm:$0xf] }
 0x302   : > { %1127 = vadd.xlane.f32.xlu0 %v1126_v62 }
 0x304   : > { %v3015_v63 = vpop.eup %2681 }
 0x305   : > { %v1129_v0 = vsel %vm691_vm3, %v3015_v63, 0.0 }
 0x306   : > { %1130 = vadd.xlane.f32.xlu0 %v1129_v0 }
 0x308   : > { %614 = vrot.lane.b32.xlu1 %v2921_v2, %s2755_s30 }
 0x30c   : > { %618 = vrot.lane.b32.xlu1 %v2905_v41, %s2754_s29 }
 0x310   : > { %621 = vrot.lane.b32.xlu1 %v2905_v41, %s2753_s28 }
 0x314   : > { %624 = vrot.lane.b32.xlu1 %v2905_v41, %s2755_s30  ;;  %v1345_v41 = vsel %vm1159_vm4, %v631_v32, 0 }
 0x31c   : > { %611 = vrot.lane.b32.xlu0 %v2921_v2, %s2753_s28 }
 0x322   : > { %v1110_v1 = vpop.xlane.xlu1 %1109 }
 0x323   : > { %2683 = vrcp.f32 %v1110_v1 }
 0x32d   : > { %v2684_v4 = vpop.eup %2683 }
 0x32e   : > { %v1140_v6 = vmul.f32 %v2684_v4, %v2992_v25 }
 0x330   : > { %v1148_v7 = vpack.c.bf16 %v1140_v6, %v1140_v6  ;;  %v2336_v6 = vld [vmem:[%s2814_s8 + $0x8] sm:$0xf]  ;;  %s2756_s8 = smov [#allocation2]  }
 0x332   : > { %2507 = vmatmul.mubr.msk.bf16.vlgmr.msra.gmra.mrb[28].mxu1 %vm691_vm3, %v1148_v7 }
 0x333   : > { %2518 = vmatprep.mubr.msk.bf16.mxu1 %vm2752_vm1, %v2751_v3 }
 0x37b   : > { %v1113_v8 = vpop.xlane.xlu0 %1112 }
 0x37c   : > { %2685 = vrcp.f32 %v1113_v8  ;;  %v1116_v9 = vpop.xlane.xlu1 %1115 }
 0x383   : > { %v1119_v10 = vpop.xlane.xlu0 %1118 }
 0x384   : > { %2687 = vrcp.f32 %v1119_v10  ;;  %v1122_v11 = vpop.xlane.xlu1 %1121  ;;  %v1629_v10 = vsel %vm1159_vm4, %v2336_v6, 0 }
 0x385   : > { %2689 = vrcp.f32 %v1116_v9 }
 0x386   : > { %v2686_v12 = vpop.eup %2685 }
 0x387   : > { %v1141_v14 = vmul.f32 %v2686_v12, %v2670_v40 }
 0x388   : > { %v615_v2 = vpop.permute.xlu1 %614 }
 0x389   : > { %v630_v16 = vpack.c.bf16 %v615_v2, %v615_v2  ;;  %v1149_v19 = vpack.c.bf16 %v1141_v14, %v1141_v14 }
 0x38b   : > { %v1299_v20 = vsel %vm1159_vm4, %v630_v16, 0  ;;  %v1125_v21 = vpop.xlane.xlu0 %1124  ;;  %2513 = vmatmul.mubr.msk.bf16.vlgmr.msra.gmra.mrb[16].mxu0 %vm691_vm3, %v1149_v19 }
 0x38c   : > { %2691 = vrcp.f32 %v1125_v21  ;;  %2523 = vmatpush3.bf16.msra.mxu0 %v1299_v20  ;;  %v619_v22 = vpop.permute.xlu1 %618  ;;  %2524 = vmatprep.mubr.msk.bf16.mxu0 %vm2752_vm1, %v2751_v3 }
 0x38d   : > { %2534 = vmatprep.subr.bf16.mxu0 %v2751_v3  ;;  %v632_v26 = vpack.c.bf16 %v619_v22, %v619_v22  ;;  %2693 = vrcp.f32 %v1122_v11 }
 0x38e   : > { %v2688_v24 = vpop.eup %2687 }
 0x38f   : > { %v1143_v25 = vmul.f32 %v2688_v24, %v2674_v51  ;;  %v1128_v27 = vpop.xlane.xlu0 %1127  ;;  %v1391_v30 = vsel %vm1159_vm4, %v632_v26, 0  ;;  %v2690_v35 = vpop.eup %2689  ;;  %v1580_v51 = vsel %vm1159_vm4, %v1526_v47, 0 }
 0x390   : > { %v622_v28 = vpop.permute.xlu1 %621  ;;  %v1142_v39 = vmul.f32 %v2690_v35, %v2998_v42 }
 0x391   : > { %v1151_v29 = vpack.c.bf16 %v1143_v25, %v1143_v25  ;;  %v633_v52 = vpack.c.bf16 %v622_v28, %v622_v28 }
 0x392   : > { %v1150_v45 = vpack.c.bf16 %v1142_v39, %v1142_v39 }
 0x393   : > { %v1131_v31 = vpop.xlane.xlu0 %1130  ;;  %2525 = vmatmul.mubr.msk.bf16.vlgmr.msra.gmra.mrb[20].mxu0 %vm691_vm3, %v1151_v29 }
 0x394   : > { %2695 = vrcp.f32 %v1131_v31  ;;  %2535 = vmatpush3.bf16.msra.mxu0 %v1391_v30  ;;  %v625_v34 = vpop.permute.xlu1 %624  ;;  %2536 = vmatprep.mubr.msk.bf16.mxu0 %vm2752_vm1, %v2751_v3 }
 0x395   : > { %2546 = vmatprep.subr.bf16.mxu0 %v2751_v3  ;;  %v634_v37 = vpack.c.bf16 %v625_v34, %v625_v34  ;;  %2697 = vrcp.f32 %v1128_v27 }
 0x396   : > { %v2692_v23 = vpop.eup %2691 }
 0x397   : > { %v1145_v36 = vmul.f32 %v2692_v23, %v2678_v59  ;;  %v612_v38 = vpop.permute.xlu0 %611  ;;  %v1483_v33 = vsel %vm1159_vm4, %v634_v37, 0  ;;  %v2694_v46 = vpop.eup %2693  ;;  %v1534_v59 = vsel %vm1159_vm4, %v2333_v58, 0 }
 0x398   : > { %v629_v40 = vpack.c.bf16 %v612_v38, %v612_v38  ;;  %v1144_v49 = vmul.f32 %v2694_v46, %v3004_v53  ;;  %v1437_v53 = vsel %vm1159_vm4, %v633_v52, 0 }
 0x399   : > { %v1153_v43 = vpack.c.bf16 %v1145_v36, %v1145_v36 }
 0x39a   : > { %v1253_v44 = vsel %vm1159_vm4, %v629_v40, 0  ;;  %v1152_v54 = vpack.c.bf16 %v1144_v49, %v1144_v49 }
 0x39b   : > { %2517 = vmatpush3.bf16.msra.mxu1 %v1253_v44  ;;  %2537 = vmatmul.mubr.msk.bf16.vlgmr.msra.gmra.mrb[24].mxu0 %vm691_vm3, %v1153_v43 }
 0x39c   : > { %2547 = vmatpush3.bf16.msra.mxu0 %v1483_v33  ;;  %2528 = vmatprep.subr.bf16.mxu1 %v2751_v3 }
 0x39d   : > { %2548 = vmatprep.mubr.msk.bf16.mxu0 %vm2752_vm1, %v2751_v3  ;;  %2558 = vmatprep.subr.bf16.mxu0 %v2751_v3 }
 0x39e   : > { %v2696_v42 = vpop.eup %2695  ;;  %2519 = vmatmul.mubr.msk.bf16.vlgmr.msra.gmra.mrb[32].mxu1 %vm691_vm3, %v1150_v45 }
 0x39f   : > { %v1147_v48 = vmul.f32 %v2696_v42, %v3015_v63  ;;  %2529 = vmatpush3.bf16.msra.mxu1 %v1345_v41  ;;  %2530 = vmatprep.mubr.msk.bf16.mxu1 %vm2752_vm1, %v2751_v3  ;;  %v2698_v55 = vpop.eup %2697 }
 0x3a0   : > { %2540 = vmatprep.subr.bf16.mxu1 %v2751_v3  ;;  %v1146_v56 = vmul.f32 %v2698_v55, %v3011_v61  ;;  %v1679_v61 = vsel %vm1159_vm4, %v2338_v60, 0 }
 0x3a1   : > { %v1155_v50 = vpack.c.bf16 %v1147_v48, %v1147_v48 }
 0x3a2   : > { %v1154_v57 = vpack.c.bf16 %v1146_v56, %v1146_v56 }
 0x3a3   : > { %2549 = vmatmul.mubr.msk.bf16.vlgmr.msra.gmra.mrb[28].mxu0 %vm691_vm3, %v1155_v50 }
 0x3a4   : > { %2559 = vmatpush3.bf16.msra.mxu0 %v1580_v51  ;;  %2560 = vmatprep.mubr.msk.bf16.mxu0 %vm2752_vm1, %v2751_v3 }
 0x3a5   : > { %2570 = vmatprep.subr.bf16.mxu0 %v2751_v3 }
 0x3a6   : > { %2531 = vmatmul.mubr.msk.bf16.vlgmr.msra.gmra.mrb[36].mxu1 %vm691_vm3, %v1152_v54 }
 0x3a7   : > { %2541 = vmatpush3.bf16.msra.mxu1 %v1437_v53  ;;  %2542 = vmatprep.mubr.msk.bf16.mxu1 %vm2752_vm1, %v2751_v3 }
 0x3a8   : > { %2552 = vmatprep.subr.bf16.mxu1 %v2751_v3 }
 0x3ae   : > { %2543 = vmatmul.mubr.msk.bf16.vlgmr.msra.gmra.mrb[40].mxu1 %vm691_vm3, %v1154_v57 }
 0x3af   : > { %2554 = vmatprep.mubr.msk.bf16.mxu1 %vm2752_vm1, %v2751_v3  ;;  %2553 = vmatpush3.bf16.msra.mxu1 %v1534_v59 }
 0x3b0   : > { %2564 = vmatprep.subr.bf16.mxu1 %v2751_v3 }
 0x405   : > { %v1197_v62 = vpop.f32.mrb[28].mxu1 }
 0x406   : > { %v1525_v63 = vpack.c.bf16 %v1197_v62, %v1197_v62  ;;  %v2508_v0 = vpop.f32.mrb[29].mxu1 }
 0x407   : > { %v1200_v1 = vpop.f32.mrb[30].mxu1 }
 0x408   : > { %v2509_v4 = vpop.f32.mrb[31].mxu1  ;;  %2561 = vmatmul.mubr.msk.bf16.vlgmr.msra.gmra.mrb[32].mxu0 %vm691_vm3, %v1525_v63 }
 0x409   : > { %2571 = vmatpush3.bf16.msra.mxu0 %v1679_v61  ;;  %2572 = vmatprep.mubr.msk.bf16.mxu0 %vm2752_vm1, %v2751_v3 }
 0x40a   : > { %2582 = vmatprep.subr.bf16.mxu0 %v2751_v3 }
 0x45e   : > { %v1243_v7 = vpop.f32.mrb[16].mxu0 }
 0x45f   : > { %v1527_v8 = vpack.c.bf16 %v1243_v7, %v1243_v7  ;;  %v2514_v9 = vpop.f32.mrb[17].mxu0 }
 0x460   : > { %v1246_v11 = vpop.f32.mrb[18].mxu0 }
 0x461   : > { %v2515_v12 = vpop.f32.mrb[19].mxu0  ;;  %2555 = vmatmul.mubr.msk.bf16.vlgmr.msra.gmra.mrb[44].mxu1 %vm691_vm3, %v1527_v8 }
 0x462   : > { %2565 = vmatpush3.bf16.msra.mxu1 %v1629_v10  ;;  %2566 = vmatprep.mubr.msk.bf16.mxu1 %vm2752_vm1, %v2751_v3 }
 0x463   : > { %2576 = vmatprep.subr.bf16.mxu1 %v2751_v3 }
 0x466   : > { %v1335_v14 = vpop.f32.mrb[20].mxu0 }
 0x467   : > { %v1672_v2 = vpack.c.bf16 %v1335_v14, %v1335_v14  ;;  %v2526_v16 = vpop.f32.mrb[21].mxu0 }
 0x468   : > { %v1338_v19 = vpop.f32.mrb[22].mxu0 }
 0x469   : > { %v2527_v20 = vpop.f32.mrb[23].mxu0  ;;  %2573 = vmatmul.mubr.msk.bf16.vlgmr.msra.gmra.mrb[36].mxu0 %vm691_vm3, %v1672_v2 }
 0x46a   : > { %2583 = vmatpush3.bf16.msra.mxu0 %v1580_v51  ;;  %2584 = vmatprep.mubr.msk.bf16.mxu0 %vm2752_vm1, %v2751_v3 }
 0x46b   : > { %2594 = vmatprep.subr.bf16.mxu0 %v2751_v3 }
 0x46e   : > { %v1427_v21 = vpop.f32.mrb[24].mxu0 }
 0x46f   : > { %v2538_v22 = vpop.f32.mrb[25].mxu0  ;;  %v1723_v37 = vpack.c.bf16 %v1427_v21, %v1427_v21 }
 0x470   : > { %v1430_v24 = vpop.f32.mrb[26].mxu0 }
 0x471   : > { %v1289_v25 = vpop.f32.mrb[32].mxu1  ;;  %v2539_v26 = vpop.f32.mrb[27].mxu0 }
 0x472   : > { %v1622_v27 = vpack.c.bf16 %v1289_v25, %v1289_v25  ;;  %v2520_v28 = vpop.f32.mrb[33].mxu1 }
 0x473   : > { %v1292_v29 = vpop.f32.mrb[34].mxu1 }
 0x474   : > { %v2521_v30 = vpop.f32.mrb[35].mxu1  ;;  %2567 = vmatmul.mubr.msk.bf16.vlgmr.msra.gmra.mrb[48].mxu1 %vm691_vm3, %v1622_v27 }
 0x475   : > { %2577 = vmatpush3.bf16.msra.mxu1 %v1534_v59  ;;  %2578 = vmatprep.mubr.msk.bf16.mxu1 %vm2752_vm1, %v2751_v3  ;;  %v1902_v59 = vsub.s32 3, %v2873_v13 }
 0x476   : > { %v1519_v31 = vpop.f32.mrb[28].mxu0  ;;  %2588 = vmatprep.subr.bf16.mxu1 %v2751_v3 }
 0x477   : > { %v2550_v34 = vpop.f32.mrb[29].mxu0  ;;  %v1855_v32 = vpack.c.bf16 %v1519_v31, %v1519_v31  ;;  %v1903_v0 = vrot.slane %v2878_v18, %v1902_v59 }
 0x478   : > { %v1522_v35 = vpop.f32.mrb[30].mxu0  ;;  %v2711_v34 = vld [vmem:[#allocation2 + $0x8] sm:$0xff] }
 0x479   : > { %v1381_v23 = vpop.f32.mrb[36].mxu1  ;;  %v2551_v36 = vpop.f32.mrb[31].mxu0 }
 0x47a   : > { %v1722_v38 = vpack.c.bf16 %v1381_v23, %v1381_v23  ;;  %v2532_v39 = vpop.f32.mrb[37].mxu1 }
 0x47b   : > { %v1384_v40 = vpop.f32.mrb[38].mxu1 }
 0x47c   : > { %v2533_v43 = vpop.f32.mrb[39].mxu1  ;;  %2579 = vmatmul.mubr.msk.bf16.vlgmr.msra.gmra.mrb[52].mxu1 %vm691_vm3, %v1723_v37  ;;  %2585 = vmatmul.mubr.msk.bf16.vlgmr.msra.gmra.mrb[40].mxu0 %vm691_vm3, %v1722_v38 }
 0x47d   : > { %2589 = vmatpush3.bf16.msra.mxu1 %v1629_v10  ;;  %2595 = vmatpush3.bf16.msra.mxu0 %v1679_v61 }
 0x47e   : > { %2590 = vmatprep.mubr.msk.bf16.mxu1 %vm2752_vm1, %v2751_v3  ;;  %2596 = vmatprep.mubr.msk.bf16.mxu0 %vm2752_vm1, %v2751_v3 }
 0x47f   : > { %2600 = vmatprep.subr.bf16.mxu1 %v2751_v3  ;;  %2608 = vmatprep.subr.bf16.mxu0 %v2751_v3 }
 0x481   : > { %v1473_v44 = vpop.f32.mrb[40].mxu1 }
 0x482   : > { %v1810_v33 = vpack.c.bf16 %v1473_v44, %v1473_v44  ;;  %v2544_v45 = vpop.f32.mrb[41].mxu1 }
 0x483   : > { %v1476_v46 = vpop.f32.mrb[42].mxu1 }
 0x484   : > { %v2545_v42 = vpop.f32.mrb[43].mxu1  ;;  %2591 = vmatmul.mubr.msk.bf16.vlgmr.msra.gmra.mrb[56].mxu1 %vm691_vm3, %v1810_v33  ;;  %2597 = vmatmul.mubr.msk.bf16.vlgmr.msra.gmra.mrb[44].mxu0 %vm691_vm3, %v1855_v32  ;;  %v2657_v46 = vld [vmem:[%s2819_s11] sm:$0xff]  }
 0x485   : > { %2604 = vmatprep.mubr.msk.bf16.mxu1 %vm2752_vm1, %v2751_v3  ;;  %2624 = vmatprep.mubr.msk.bf16.mxu0 %vm2752_vm1, %v2751_v3  ;;  %v2658_v42 = vld [vmem:[%s2819_s11 + $0x8] sm:$0xff]   ;;  %s2188_s11 = sshll.u32 %s2756_s8, 4  ;;  %s2189_s11 = int_to_ptr.vmem [resolvable:$true] %s2188_s11 }
 0x486   : > { %2601 = vmatpush3.bf16.msra.mxu1 %v2657_v46  ;;  %p2720_p9 = scmp.lt.s32.totalorder %s2189_s11, %s2189_s11 }
 0x487   : > { %2602 = vmatprep.subr.bf16.mxu1 %v2751_v3 }
 0x48a   : > { %2603 = vmatpush3.bf16.msra.mxu1 %v2658_v42 }
 0x4db   : > { %v1616_v41 = vpop.f32.mrb[32].mxu0 }
 0x4dc   : > { %v2562_v47 = vpop.f32.mrb[33].mxu0 }
 0x4dd   : > { %v1619_v48 = vpop.f32.mrb[34].mxu0 }
 0x4de   : > { %v2563_v49 = vpop.f32.mrb[35].mxu0 }
 0x534   : > { %v1570_v50 = vpop.f32.mrb[44].mxu1 }
 0x535   : > { %v1617_v51 = vadd.f32 %v1616_v41, %v1570_v50  ;;  %v2556_v52 = vpop.f32.mrb[45].mxu1 }
 0x536   : > { %v1573_v54 = vpop.f32.mrb[46].mxu1  ;;  %v1937_v52 = vsub.s32 6, %v2873_v13 }
 0x537   : > { %v2557_v55 = vpop.f32.mrb[47].mxu1 }
 0x538   : > { %v1938_v55 = vrot.slane %v2878_v18, %v1937_v52 }
 0x53c   : > { %v1715_v53 = vpop.f32.mrb[36].mxu0 }
 0x53d   : > { %v2574_v56 = vpop.f32.mrb[37].mxu0 }
 0x53e   : > { %v1718_v57 = vpop.f32.mrb[38].mxu0  ;;  %v1943_v56 = vsub.s32 7, %v2873_v13 }
 0x53f   : > { %v2575_v58 = vpop.f32.mrb[39].mxu0 }
 0x547   : > { %v1665_v60 = vpop.f32.mrb[48].mxu1 }
 0x548   : > { %v1671_v62 = vadd.f32 %v1665_v60, %v1617_v51  ;;  %v2568_v63 = vpop.f32.mrb[49].mxu1  ;;  %v1944_v60 = vrot.slane %v2878_v18, %v1943_v56  ;;  %v2661_v18 = vld [vmem:[%s2829_s18 + $0x10] sm:$0xff]  }
 0x549   : > { %v1668_v61 = vpop.f32.mrb[50].mxu1 }
 0x54a   : > { %v1721_v1 = vadd.f32 %v1715_v53, %v1671_v62  ;;  %v2569_v4 = vpop.f32.mrb[51].mxu1 }
 0x54b   : > { %v2660_v4 = vld [vmem:[%s2829_s18 + $0x8] sm:$0xff]  }
 0x54c   : > { %v1904_v6 = vadd.f32 %v1903_v0, %v1721_v1  ;;  %v2659_v1 = vld [vmem:[%s2829_s18] sm:$0xff]  }
 0x54d   : > { %2609 = vmatpush3.bf16.msra.mxu0 %v2659_v1 }
 0x54e   : > { %v1906_v7 = vadd.f32 %v1904_v6, %v2849_v5  ;;  %2610 = vmatprep.subr.bf16.mxu0 %v2751_v3  ;;  %v2662_v6 = vld [vmem:[%s2829_s18 + $0x18] sm:$0xff]  }
 0x54f   : > { %v1761_v8 = vpop.f32.mrb[52].mxu1  ;;  %v1804_v9 = vpop.f32.mrb[40].mxu0 }
 0x550   : > { %v1805_v10 = vadd.f32 %v1804_v9, %v1761_v8  ;;  %v2580_v11 = vpop.f32.mrb[53].mxu1  ;;  %v2586_v12 = vpop.f32.mrb[41].mxu0  ;;  %v1908_v14 = vsel %vm380_vm2, %v1906_v7, 0.0  ;;  %v2664_v8 = vld [vmem:[%s2829_s18 + $0x28] sm:$0xff]   ;;  %v2665_v9 = vld [vmem:[%s2829_s18 + $0x30] sm:$0xff]  }
 0x551   : > { %v1807_v2 = vpop.f32.mrb[42].mxu0  ;;  %1909 = vadd.xlane.f32.xlu0 %v1908_v14  ;;  %v1764_v16 = vpop.f32.mrb[54].mxu1  ;;  %2611 = vmatpush3.bf16.msra.mxu0 %v2660_v4  ;;  %v1954_v11 = vsub.s32 4, %v2873_v13  ;;  %v2712_v12 = vld [vmem:[%s2834_s21] sm:$0xff] }
 0x552   : > { %v2581_v19 = vpop.f32.mrb[55].mxu1  ;;  %v2587_v20 = vpop.f32.mrb[43].mxu0  ;;  %2612 = vmatprep.subr.bf16.mxu0 %v2751_v3 }
 0x553   : > { %v1955_v14 = vrot.slane %v2712_v12, %v1954_v11 }
 0x555   : > { %2613 = vmatpush3.bf16.msra.mxu0 %v2661_v18 }
 0x556   : > { %2614 = vmatprep.subr.bf16.mxu0 %v2751_v3 }
 0x557   : > { %v1848_v21 = vpop.f32.mrb[56].mxu1  ;;  %v1893_v22 = vpop.f32.mrb[44].mxu0 }
 0x558   : > { %v1854_v24 = vadd.f32 %v1848_v21, %v1805_v10  ;;  %v2592_v25 = vpop.f32.mrb[57].mxu1  ;;  %v2598_v26 = vpop.f32.mrb[45].mxu0  ;;  %v2666_v10 = vld [vmem:[%s2829_s18 + $0x38] sm:$0xff]  }
 0x559   : > { %v1851_v27 = vpop.f32.mrb[58].mxu1  ;;  %v1896_v28 = vpop.f32.mrb[46].mxu0  ;;  %2615 = vmatpush3.bf16.msra.mxu0 %v2662_v6  ;;  %v358_v6 = vld [vmem:[%s2834_s21 + $0x8] sm:$0xff] }
 0x55a   : > { %v1899_v5 = vadd.f32 %v1893_v22, %v1854_v24  ;;  %v2593_v29 = vpop.f32.mrb[59].mxu1  ;;  %v2599_v30 = vpop.f32.mrb[47].mxu0  ;;  %2616 = vmatprep.subr.bf16.mxu0 %v2751_v3 }
 0x55c   : > { %v1905_v31 = vadd.f32 %v1903_v0, %v1899_v5 }
 0x55e   : > { %v1907_v35 = vadd.f32 %v2711_v34, %v1905_v31 }
 0x560   : > { %v1911_v23 = vsel %vm380_vm2, %v1907_v35, 0.0 }
 0x561   : > { %1912 = vadd.xlane.f32.xlu1 %v1911_v23 }
 0x5de   : > { %v1910_v36 = vpop.xlane.xlu0 %1909 }
 0x5df   : > { %v1915_v37 = vmul.f32 0.03125, %v1910_v36 }
 0x5e1   : > { %v1917_v38 = vsub.f32 %v1906_v7, %v1915_v37  ;;  %v2663_v7 = vld [vmem:[%s2829_s18 + $0x20] sm:$0xff]   ;;  %s2713_s18 = scalar_lea.vmem %s2189_s11, 256 }
 0x5e2   : > { %2617 = vmatpush3.bf16.msra.mxu0 %v2663_v7  ;;  %v2171_v7 = vrot.slane %v358_v6, %v366_v15  ;;  %p2714_p6 = scmp.ne.s32.totalorder %s2189_s11, %s2713_s18  ;;  %p2721_p10 = scmp.lt.s32.totalorder %s2713_s18, %s2713_s18 }
 0x5e3   : > { %v1919_v39 = vmul.f32 %v1917_v38, %v1917_v38  ;;  %2618 = vmatprep.subr.bf16.mxu0 %v2751_v3 }
 0x5e4   : > { %p2715_p7 = pnand %p2714_p6, %p2633_p5  ;;  %p2722_p11 = por %p2721_p10, %p2720_p9 }
 0x5e5   : > { %v1921_v40 = vsel %vm380_vm2, %v1919_v39, 0.0 }
 0x5e6   : > { %1922 = vadd.xlane.f32.xlu0 %v1921_v40  ;;  %2619 = vmatpush3.bf16.msra.mxu0 %v2664_v8  ;;  %p2716_p8 = pneg %p2715_p7 }
 0x5e7   : > { %2620 = vmatprep.subr.bf16.mxu0 %v2751_v3 }
 0x5e8   : > { %p2723_p12 = pnand %p2722_p11, %p2716_p8 }
 0x5ea   : > { %2621 = vmatpush3.bf16.msra.mxu0 %v2665_v9  ;;  %v2177_v9 = vrot.slane %v358_v6, %v434_v17 }
 0x5eb   : > { %2622 = vmatprep.subr.bf16.mxu0 %v2751_v3 }
 0x5ee   : > { %v1913_v43 = vpop.xlane.xlu1 %1912  ;;  %2623 = vmatpush3.bf16.msra.mxu0 %v2666_v10 }
 0x5ef   : > { %v1916_v44 = vmul.f32 0.03125, %v1913_v43 }
 0x5f1   : > { %v1918_v32 = vsub.f32 %v1907_v35, %v1916_v44  ;;  %v2049_v44 = vsub.s32 5, %v2873_v13 }
 0x5f3   : > { %v1920_v33 = vmul.f32 %v1918_v32, %v1918_v32 }
 0x5f5   : > { %v1924_v45 = vsel %vm380_vm2, %v1920_v33, 0.0 }
 0x5f6   : > { %1925 = vadd.xlane.f32.xlu0 %v1924_v45 }
 0x673   : > { %v1923_v41 = vpop.xlane.xlu0 %1922 }
 0x674   : > { %v1927_v47 = vmul.f32 0.03125, %v1923_v41 }
 0x676   : > { %v1929_v48 = vadd.f32 1e-12, %v1927_v47 }
 0x678   : > { %2699 = vrsqrt.f32 %v1929_v48 }
 0x682   : > { %v2700_v54 = vpop.eup %2699 }
 0x683   : > { %v1926_v49 = vpop.xlane.xlu0 %1925  ;;  %v1933_v53 = vmul.f32 %v2700_v54, %v1917_v38 }
 0x684   : > { %v1928_v50 = vmul.f32 0.03125, %v1926_v49 }
 0x685   : > { %v1939_v58 = vmul.f32 %v1938_v55, %v1933_v53 }
 0x686   : > { %v1930_v51 = vadd.f32 1e-12, %v1928_v50 }
 0x687   : > { %v3126_v63 = vadd.f32 %v1944_v60, %v1939_v58 }
 0x688   : > { %2701 = vrsqrt.f32 %v1930_v51 }
 0x692   : > { %v2702_v57 = vpop.eup %2701 }
 0x693   : > { %v1934_v59 = vmul.f32 %v2702_v57, %v1918_v32  ;;  %v2050_v32 = vrot.slane %v2712_v12, %v2049_v44 }
 0x695   : > { %v1940_v62 = vmul.f32 %v1938_v55, %v1934_v59 }
 0x697   : > { %v3128_v0 = vadd.f32 %v1944_v60, %v1940_v62 }
 0x699   : > { %v1947_v61 = vpack.c.bf16 %v3128_v0, %v3126_v63 }
 0x69b   : > { %2605 = vmatmul.mubr.msk.bf16.vlgmr.msra.gmra.mrb[60].mxu1 %vm380_vm2, %v1947_v61 }
 0x76e   : > { %v2005_v2 = vpop.f32.mrb[60].mxu1 }
 0x76f   : > { %v2006_v16 = vadd.f32 %v2005_v2, %v1955_v14  ;;  %v2606_v19 = vpop.f32.mrb[61].mxu1 }
 0x770   : > { %v2008_v20 = vpop.f32.mrb[62].mxu1 }
 0x771   : > { %v2014_v21 = vmul.f32 0.044715, %v2006_v16  ;;  %v2009_v22 = vadd.f32 %v2008_v20, %v1955_v14  ;;  %v2607_v24 = vpop.f32.mrb[63].mxu1  ;;  %v2012_v36 = vmul.f32 0.5, %v2006_v16 }
 0x773   : > { %v2016_v25 = vmul.f32 %v2014_v21, %v2006_v16  ;;  %v2015_v26 = vmul.f32 0.044715, %v2009_v22  ;;  %v2013_v37 = vmul.f32 0.5, %v2009_v22 }
 0x775   : > { %v2018_v27 = vmul.f32 %v2016_v25, %v2006_v16  ;;  %v2017_v28 = vmul.f32 %v2015_v26, %v2009_v22 }
 0x777   : > { %v2020_v5 = vadd.f32 %v2018_v27, %v2006_v16  ;;  %v2019_v29 = vmul.f32 %v2017_v28, %v2009_v22 }
 0x779   : > { %v2022_v30 = vmul.f32 0.7978846, %v2020_v5  ;;  %v2021_v3 = vadd.f32 %v2019_v29, %v2009_v22 }
 0x77b   : > { %2703 = vtanh.f32 %v2022_v30  ;;  %v2023_v31 = vmul.f32 0.7978846, %v2021_v3 }
 0x77d   : > { %2705 = vtanh.f32 %v2023_v31 }
 0x785   : > { %v2704_v34 = vpop.eup %2703 }
 0x786   : > { %v2026_v35 = vadd.f32 1.0, %v2704_v34 }
 0x787   : > { %v2706_v23 = vpop.eup %2705 }
 0x788   : > { %v2027_v38 = vadd.f32 1.0, %v2706_v23  ;;  %v2028_v39 = vmul.f32 %v2026_v35, %v2012_v36 }
 0x78a   : > { %v2029_v40 = vmul.f32 %v2027_v38, %v2013_v37 }
 0x78c   : > { %v2030_v43 = vpack.c.bf16 %v2029_v40, %v2028_v39 }
 0x78e   : > { %2625 = vmatmul.mubr.bf16.vlgmr.msra.gmra.mrb[48].mxu0 %v2030_v43 }
 0x861   : > { %v2133_v33 = vpop.f32.mrb[48].mxu0 }
 0x862   : > { %v2134_v45 = vadd.f32 %v2133_v33, %v2050_v32  ;;  %v2626_v46 = vpop.f32.mrb[49].mxu0 }
 0x863   : > { %v2136_v42 = vpop.f32.mrb[50].mxu0 }
 0x864   : > { %v2137_v41 = vadd.f32 %v2136_v42, %v2050_v32  ;;  %v2627_v47 = vpop.f32.mrb[51].mxu0  ;;  %v2140_v48 = vadd.f32 %v2134_v45, %v3126_v63 }
 0x866   : > { %v2142_v49 = vsel %vm380_vm2, %v2140_v48, 0.0  ;;  %v2141_v50 = vadd.f32 %v2137_v41, %v3128_v0 }
 0x867   : > { %2143 = vadd.xlane.f32.xlu1 %v2142_v49 }
 0x868   : > { %v2145_v51 = vsel %vm380_vm2, %v2141_v50, 0.0 }
 0x869   : > { %2146 = vadd.xlane.f32.xlu0 %v2145_v51 }
 0x8f4   : > { %v2144_v52 = vpop.xlane.xlu1 %2143 }
 0x8f5   : > { %v2148_v54 = vmul.f32 0.03125, %v2144_v52 }
 0x8f6   : > { %v2147_v55 = vpop.xlane.xlu0 %2146 }
 0x8f7   : > { %v2150_v53 = vsub.f32 %v2140_v48, %v2148_v54  ;;  %v2149_v56 = vmul.f32 0.03125, %v2147_v55 }
 0x8f9   : > { %v2151_v57 = vsub.f32 %v2141_v50, %v2149_v56  ;;  %v2152_v58 = vmul.f32 %v2150_v53, %v2150_v53 }
 0x8fb   : > { %v2154_v59 = vsel %vm380_vm2, %v2152_v58, 0.0  ;;  %v2153_v60 = vmul.f32 %v2151_v57, %v2151_v57 }
 0x8fc   : > { %2155 = vadd.xlane.f32.xlu1 %v2154_v59 }
 0x8fd   : > { %v2157_v62 = vsel %vm380_vm2, %v2153_v60, 0.0 }
 0x8fe   : > { %2158 = vadd.xlane.f32.xlu0 %v2157_v62 }
 0x989   : > { %v2156_v63 = vpop.xlane.xlu1 %2155 }
 0x98a   : > { %v2160_v0 = vmul.f32 0.03125, %v2156_v63 }
 0x98b   : > { %v2159_v61 = vpop.xlane.xlu0 %2158 }
 0x98c   : > { %v2162_v1 = vadd.f32 1e-12, %v2160_v0  ;;  %v2161_v4 = vmul.f32 0.03125, %v2159_v61 }
 0x98e   : > { %2707 = vrsqrt.f32 %v2162_v1  ;;  %v2163_v18 = vadd.f32 1e-12, %v2161_v4 }
 0x990   : > { %2709 = vrsqrt.f32 %v2163_v18 }
 0x998   : > { %v2708_v8 = vpop.eup %2707 }
 0x999   : > { %v2166_v10 = vmul.f32 %v2708_v8, %v2150_v53 }
 0x99a   : > { %v2710_v11 = vpop.eup %2709 }
 0x99b   : > { %v2172_v12 = vmul.f32 %v2171_v7, %v2166_v10  ;;  %v2167_v14 = vmul.f32 %v2710_v11, %v2151_v57 }
 0x99d   : > { %v2173_v2 = vmul.f32 %v2171_v7, %v2167_v14  ;;  %v2178_v16 = vadd.f32 %v2177_v9, %v2172_v12 }
 0x99f   : > { %v2179_v19 = vadd.f32 %v2177_v9, %v2173_v2  ;;  %2180 = vst.msk [vmem:[#allocation2] sm:$0xff] %vm380_vm2, %v2178_v16 }
 0x9a1   : > { %2181 = vst.msk [vmem:[#allocation2 + $0x8] sm:$0xff] %vm380_vm2, %v2179_v19 }
 0x9a2   : > { %2726 = shalt.err (!%p2723_p12)
}
 0x9a3   : > { %s2727_s29 = scalar_lea.hbm %s3197_s7, 256 }
 0x9a4   : > { %p2728_p13 = scmp.ne.s32.totalorder %s3197_s7, %s2727_s29  ;;  %p2733_p2 = scmp.lt.u32.totalorder %s2727_s29, %s3197_s7 }
 0x9a6   : > { %p2729_p0 = pnand %p2728_p13, %p2633_p5 }
 0x9a8   : > { %p2730_p1 = pneg %p2729_p0 }
 0x9aa   : > { %p2735_p3 = pnand %p2733_p2, %p2730_p1 }
 0x9ac   : > { %2738 = shalt.err (!%p2735_p3)
}
 0x9ad   : > { %s2757_s15 = smov 128   ;;  %s2758_s16 = smov 8  }
 0x9ae   : > { %2630 = dma.vmem_to_hbm [thread:$0]  (%p2633_p5), %s2189_s11, 256, %s3197_s7, [#allocation3], %s2757_s15, %s2757_s15, %s2758_s16  }
 0x9af   : > { %2744 = dma.done.wait (%p2633_p5), [#allocation3], 256  }
 0x9b0   : > { %2746 = vsyncadd (%p2633_p5), [#allocation3], 4294967040 }
 0x9b1 PF: > { %s18_s24 = sadd.s32 1, %s2749_s24  }
 0x9b2   : > { %p15_p4 = scmp.ge.s32.totalorder %s18_s24, 4  }
 0x9b4   :  { %17 = sbr.rel (!%p15_p4) target bundleno = 1 (0x1), region = 96 }
 0x9bb   :  { %2204 = vsyncpa [#allocation3], 1 }
 0x9bc   :  { %2206 = vsyncpa [#allocation3 + $0x1], 1 }

</bundles_post_ra>
